<compile_context>
chip_gen: v5e
topology: v5e:2x2
jax: 0.10.0
libtpu: 0.0.40
codegen_flags: <defaults>
</compile_context>

<pallas_src>
import functools
import math
import numpy as np
import jax
import jax.numpy as jnp
from jax import lax
from jax.experimental import pallas as pl
from jax.experimental.pallas import tpu as pltpu

# ----------------------------- hyper-parameters ------------------------------
N_VOCAB      = 32
N_LAYERS     = 3                 # encoder stack has n_layers - 1 = 2 EncoderLayers
N_ENC_LAYERS = N_LAYERS - 1
PAD_ID       = 0
FINALE_ID    = 2
D_MODEL      = 128               # d_enc_model
D_EMB        = 128               # d_model (latent dim of out_mu / out_var)
D_INNER      = 256
N_HEAD       = 2
D_K          = 64
D_V          = 64
N_SEQ_MAX    = 16
SCALE_EMB    = True
LN_EPS       = 1e-6

B  = 2                           # batch
S  = 8                           # sequence length
BS = B * S

N_NVEC = 2 + 5 * N_ENC_LAYERS    # enc_ln(g,b) + per layer (ln1 g,b, ln2 g,b, b2)


# --------------------------------- kernel ------------------------------------
def fused_kernel(onehot_ref, bias_ref, eps_sel_ref,
                 embpos_ref, slab_ref, w2_ref, wout_ref, nvec_ref, b1_ref,
                 z_ref, *, var_factor):
    f32 = jnp.float32
    bf16 = jnp.bfloat16
    inv_d = 1.0 / D_MODEL

    def layernorm(x, g, b):
        # var = E[x^2] - E[x]^2 : two independent cross-lane reductions
        s1 = jnp.sum(x, axis=-1, keepdims=True)
        s2 = jnp.sum(x * x, axis=-1, keepdims=True)
        mean = s1 * inv_d
        var = s2 * inv_d - mean * mean
        return (x - mean) * lax.rsqrt(var + LN_EPS) * g + b

    nvec = nvec_ref[...]                                  # (N_NVEC, 128) f32
    b1s  = b1_ref[...]                                    # (L, 256)      f32
    bias = bias_ref[...]                                  # (BS, BS)      f32 additive

    # per-head lane masks (static, hoisted out of the layer loop)
    lane = lax.broadcasted_iota(jnp.int32, (1, D_MODEL), 1)
    head_masks = [((lane >= h * D_K) & (lane < (h + 1) * D_K)).astype(f32)
                  for h in range(N_HEAD)]

    # ---- embedding + positional encoding: one exact f32 selection matmul ----
    # embpos = [emb * sqrt(d_model) ; pos_table], onehot = [vocab 1-hot | pos 1-hot]
    x = jnp.dot(onehot_ref[...], embpos_ref[...], preferred_element_type=f32)  # (BS,128)
    x = layernorm(x, nvec[0:1, :], nvec[1:2, :])

    # ---- encoder layers: all weights + activations stay resident in VMEM ----
    for l in range(N_ENC_LAYERS):                         # static unroll
        slab = slab_ref[l]                                # (128, 768) bf16
        x_bf = x.astype(bf16)
        # fused QKV projection (Wq pre-scaled by 1/sqrt(d_k))
        qkv = jnp.dot(x_bf, slab[:, 0:3 * D_MODEL], preferred_element_type=f32)  # (BS,384)
        q    = qkv[:, 0:D_MODEL]                          # f32 (scaled)
        k_bf = qkv[:, D_MODEL:2 * D_MODEL].astype(bf16)
        v_bf = qkv[:, 2 * D_MODEL:3 * D_MODEL].astype(bf16)
        wo = slab[:, 3 * D_MODEL:4 * D_MODEL]             # (128,128) bf16
        w1 = slab[:, 4 * D_MODEL:4 * D_MODEL + D_INNER]   # (128,256) bf16

        acc = None
        for h in range(N_HEAD):                           # static unroll
            m = head_masks[h]
            # mask q to head-h lanes -> full-width contraction == q_h . k_h
            qh = (q * m).astype(bf16)
            scores = lax.dot_general(qh, k_bf, (((1,), (1,)), ((), ())),
                                     preferred_element_type=f32)        # (BS,BS)
            scores = scores + bias
            scores = scores - jnp.max(scores, axis=-1, keepdims=True)
            e = jnp.exp(scores)
            attn = e * pl.reciprocal(jnp.sum(e, axis=-1, keepdims=True), approx=True)
            ctx = jnp.dot(attn.astype(bf16), v_bf, preferred_element_type=f32)  # (BS,128)
            # masked ctx @ Wo == ctx_h @ Wo[h*dv:(h+1)*dv, :]  (W_O fold, no lane slice)
            part = jnp.dot((ctx * m).astype(bf16), wo, preferred_element_type=f32)
            acc = part if acc is None else acc + part     # back-to-back accumulation

        base = 2 + 5 * l
        h1 = layernorm(acc + x, nvec[base:base + 1, :], nvec[base + 1:base + 2, :])
        f = jnp.dot(h1.astype(bf16), w1, preferred_element_type=f32) + b1s[l:l + 1, :]
        f = jnp.maximum(f, 0.0)
        f = jnp.dot(f.astype(bf16), w2_ref[l], preferred_element_type=f32) \
            + nvec[base + 4:base + 5, :]
        x = layernorm(f + h1, nvec[base + 2:base + 3, :], nvec[base + 3:base + 4, :])

    # ---- finale gather + fused mu|logvar head + reparameterization ----
    eps_sel = eps_sel_ref[...]                            # (B, D_EMB + BS) f32
    eps = eps_sel[:, 0:D_EMB]
    sel = eps_sel[:, D_EMB:D_EMB + BS]
    # TODO(synk): enc_output[seq == finale_id] is a ragged boolean gather; assume
    # exactly one finale token per sequence and implement it as a selection matmul.
    finale = jnp.dot(sel, x, preferred_element_type=f32)                 # (B, 128)
    mulv = jnp.dot(finale.astype(bf16), wout_ref[...],
                   preferred_element_type=f32)                           # (B, 256)
    mu = mulv[:, 0:D_EMB]
    z = mu
    if var_factor != 0.0:
        logvar = mulv[:, D_EMB:2 * D_EMB]
        z = z + eps * jnp.exp(0.5 * logvar) * var_factor
    z_ref[...] = z


# ------------------------------ pallas wrapper --------------------------------
def _full_spec(shape):
    nd = len(shape)
    return pl.BlockSpec(shape, lambda i, _nd=nd: (0,) * _nd)


def pack_params(params):
    """One-time (per model) weight packing -> few lane-dense VMEM slabs."""
    embpos = jnp.concatenate(
        [params['emb'] * (math.sqrt(D_MODEL) if SCALE_EMB else 1.0),
         params['pos_table']], axis=0)                                   # (48,128) f32
    # fold 1/sqrt(d_k) into Wq (exact: 1/8 is a power of two)
    slab = jnp.concatenate(
        [params['wq'] * (1.0 / math.sqrt(D_K)), params['wk'], params['wv'],
         params['wo'], params['w1']], axis=2)                            # (L,128,768) bf16
    rows = [params['enc_ln_g'], params['enc_ln_b']]
    for l in range(N_ENC_LAYERS):
        rows += [params['ln1_g'][l], params['ln1_b'][l],
                 params['ln2_g'][l], params['ln2_b'][l], params['b2'][l]]
    nvec = jnp.concatenate(rows, axis=0)                                 # (N_NVEC,128) f32
    return dict(
        embpos=embpos,
        slab=slab,
        w2=params['w2'],                                                 # (L,256,128) bf16
        wout=jnp.concatenate([params['w_mu'], params['w_var']], axis=1), # (128,256) bf16
        nvec=nvec,
        b1=params['b1'].reshape(N_ENC_LAYERS, D_INNER),                  # (L,256) f32
    )


@functools.partial(jax.jit, static_argnames=("var_factor",))
def seqvae_jit_forward(packed, seq, eps, *, var_factor=1.0):
    seq = seq.astype(jnp.int32)
    b_, s_ = seq.shape
    bs = b_ * s_
    f32 = jnp.float32

    # vocab one-hot | position one-hot (so emb*sqrt(d) + pos is one matmul in-kernel)
    seq_flat = seq.reshape(bs)
    vocab_oh = jax.nn.one_hot(seq_flat, N_VOCAB, dtype=f32)              # (BS, 32)
    pos_oh = jax.nn.one_hot(jnp.tile(jnp.arange(s_, dtype=jnp.int32), b_),
                            N_SEQ_MAX, dtype=f32)                        # (BS, 16)
    onehot = jnp.concatenate([vocab_oh, pos_oh], axis=1)                 # (BS, 48)

    # block-diagonal additive attention bias: pad & causal within a batch block,
    # -1e9 across batch blocks (enables batched-over-B attention).
    pad = seq != PAD_ID                                                  # (B, S)
    causal = jnp.tril(jnp.ones((s_, s_), dtype=bool))                    # (S, S)
    keep = pad[:, None, :] & causal[None, :, :]                          # (B, S, S)
    eye_b = jnp.eye(b_, dtype=bool)
    keep_full = (eye_b[:, None, :, None] & keep[:, :, None, :]).reshape(bs, bs)
    bias = jnp.where(keep_full, 0.0, -1e9).astype(f32)                   # (BS, BS)

    # finale-token selection matrix + reparameterization noise (one DMA)
    fin = (seq == FINALE_ID).astype(f32)                                 # (B, S)
    sel = (jnp.eye(b_, dtype=f32)[:, :, None] * fin[None, :, :]).reshape(b_, bs)
    eps_sel = jnp.concatenate([eps.astype(f32), sel], axis=1)            # (B, D_EMB+BS)

    args = (onehot, bias, eps_sel,
            packed['embpos'], packed['slab'], packed['w2'],
            packed['wout'], packed['nvec'], packed['b1'])

    return pl.pallas_call(
        functools.partial(fused_kernel, var_factor=float(var_factor)),
        out_shape=jax.ShapeDtypeStruct((b_, D_EMB), jnp.float32),
        grid=(1,),
        in_specs=[_full_spec(a.shape) for a in args],
        out_specs=_full_spec((b_, D_EMB)),
        compiler_params=pltpu.CompilerParams(dimension_semantics=("arbitrary",)),
    )(*args)


# ------------------------------ parameter init --------------------------------
def _sinusoid_table(n_position, d_hid):
    pos = np.arange(n_position)[:, None].astype(np.float64)
    i = np.arange(d_hid)[None, :].astype(np.float64)
    angle = pos / np.power(10000.0, 2.0 * (i // 2) / d_hid)
    table = np.zeros((n_position, d_hid), dtype=np.float32)
    table[:, 0::2] = np.sin(angle[:, 0::2])
    table[:, 1::2] = np.cos(angle[:, 1::2])
    return jnp.asarray(table)


def _linear(key, fan_in, fan_out, scale=0.05, dtype=jnp.bfloat16):
    return (jax.random.normal(key, (fan_in, fan_out), jnp.float32) * scale).astype(dtype)


def _encoder_layer_params(key):
    ks = jax.random.split(key, 6)
    return dict(
        wq=_linear(ks[0], D_MODEL, N_HEAD * D_K),
        wk=_linear(ks[1], D_MODEL, N_HEAD * D_K),
        wv=_linear(ks[2], D_MODEL, N_HEAD * D_V),
        wo=_linear(ks[3], N_HEAD * D_V, D_MODEL),
        ln1_g=jnp.ones((1, D_MODEL), jnp.float32),
        ln1_b=jnp.zeros((1, D_MODEL), jnp.float32),
        w1=_linear(ks[4], D_MODEL, D_INNER),
        b1=jnp.zeros((1, D_INNER), jnp.float32),
        w2=_linear(ks[5], D_INNER, D_MODEL),
        b2=jnp.zeros((1, D_MODEL), jnp.float32),
        ln2_g=jnp.ones((1, D_MODEL), jnp.float32),
        ln2_b=jnp.zeros((1, D_MODEL), jnp.float32),
    )


def init_params(key):
    keys = jax.random.split(key, 3 + N_ENC_LAYERS)
    k_emb, k_mu, k_var = keys[0], keys[1], keys[2]
    emb = jax.random.normal(k_emb, (N_VOCAB, D_MODEL), jnp.float32) * 0.02
    emb = emb.at[PAD_ID].set(0.0)                    # nn.Embedding padding_idx row
    layers = [_encoder_layer_params(k) for k in keys[3:]]
    stacked = {name: jnp.stack([lp[name] for lp in layers]) for name in layers[0]}
    return dict(
        emb=emb,                                     # kept f32 (exact gather path)
        pos_table=_sinusoid_table(N_SEQ_MAX, D_MODEL),
        enc_ln_g=jnp.ones((1, D_MODEL), jnp.float32),
        enc_ln_b=jnp.zeros((1, D_MODEL), jnp.float32),
        w_mu=_linear(k_mu, D_MODEL, D_EMB),
        w_var=_linear(k_var, D_MODEL, D_EMB),
        **stacked,
    )


# ---------------------------- plain-JAX reference ------------------------------
def _ref_ln(x, g, b):
    m = jnp.mean(x, axis=-1, keepdims=True)
    v = jnp.mean((x - m) ** 2, axis=-1, keepdims=True)
    return (x - m) / jnp.sqrt(v + LN_EPS) * g + b


def _ref_layer(x, keep_mask, p, l):
    f32 = jnp.float32
    q = (x @ p['wq'][l].astype(f32)).reshape(B, S, N_HEAD, D_K).transpose(0, 2, 1, 3)
    k = (x @ p['wk'][l].astype(f32)).reshape(B, S, N_HEAD, D_K).transpose(0, 2, 1, 3)
    v = (x @ p['wv'][l].astype(f32)).reshape(B, S, N_HEAD, D_V).transpose(0, 2, 1, 3)
    scores = jnp.einsum('bhqd,bhkd->bhqk', q, k) / math.sqrt(D_K)
    scores = jnp.where(keep_mask[:, None, :, :], scores, -1e9)
    attn = jax.nn.softmax(scores, axis=-1)
    ctx = jnp.einsum('bhqk,bhkd->bhqd', attn, v).transpose(0, 2, 1, 3)
    ctx = ctx.reshape(B, S, N_HEAD * D_V)
    h1 = _ref_ln(ctx @ p['wo'][l].astype(f32) + x, p['ln1_g'][l], p['ln1_b'][l])
    f = jnp.maximum(h1 @ p['w1'][l].astype(f32) + p['b1'][l], 0.0)
    f = f @ p['w2'][l].astype(f32) + p['b2'][l]
    return _ref_ln(f + h1, p['ln2_g'][l], p['ln2_b'][l])


def reference(params, seq, eps, var_factor=1.0):
    f32 = jnp.float32
    seq = seq.astype(jnp.int32)
    pad = seq != PAD_ID
    causal = jnp.tril(jnp.ones((S, S), dtype=bool))
    keep = pad[:, None, :] & causal[None, :, :]
    x = jnp.take(params['emb'], seq, axis=0)
    if SCALE_EMB:
        x = x * math.sqrt(D_MODEL)
    x = x + params['pos_table'][None, :S, :]
    x = _ref_ln(x, params['enc_ln_g'], params['enc_ln_b'])
    for l in range(N_ENC_LAYERS):
        x = _ref_layer(x, keep, params, l)
    fin_mask = np.asarray(seq) == FINALE_ID
    finale = jnp.asarray(np.asarray(x)[fin_mask])                # (n_finale, D)
    mu = finale @ params['w_mu'].astype(f32)
    logvar = finale @ params['w_var'].astype(f32)
    z = mu
    if var_factor != 0:
        z = z + eps * jnp.exp(0.5 * logvar) * var_factor
    return z


# ------------------------------------ main -------------------------------------
if __name__ == "__main__":
    root = jax.random.PRNGKey(0)
    k_params, k_eps = jax.random.split(root)
    params = init_params(k_params)
    packed = pack_params(params)

    # one finale token (id=2) per sequence, trailing pads (id=0)
    seq = jnp.array([[5, 7, 3, 9, FINALE_ID, 0, 0, 0],
                     [4, 6, 8, 11, 13, 15, FINALE_ID, 0]], dtype=jnp.int32)
    # torch.randn_like(std) noise is drawn once here and shared with the reference
    eps = jax.random.normal(k_eps, (B, D_EMB), jnp.float32)

    z = seqvae_jit_forward(packed, seq, eps, var_factor=1.0)
    jax.block_until_ready(z)

    z_ref = reference(params, seq, eps, var_factor=1.0)
    assert z.shape == (B, D_EMB)
    # kernel matmuls run with bf16 operands (f32 accumulation); reference is f32,
    # so tolerance is relaxed accordingly.
    assert np.allclose(np.asarray(z), np.asarray(z_ref), atol=2e-2, rtol=2e-2)

    print("KERNEL_OK")
</pallas_src>

<mosaic_0001>
module attributes {stable_mosaic.version = 11 : i64} {
  func.func @fused_kernel(%arg0: i32, %arg1: memref<16x48xf32, #tpu.memory_space<vmem>>, %arg2: memref<16x16xf32, #tpu.memory_space<vmem>>, %arg3: memref<2x144xf32, #tpu.memory_space<vmem>>, %arg4: memref<48x128xf32, #tpu.memory_space<vmem>>, %arg5: memref<2x128x768xbf16, #tpu.memory_space<vmem>>, %arg6: memref<2x256x128xbf16, #tpu.memory_space<vmem>>, %arg7: memref<128x256xbf16, #tpu.memory_space<vmem>>, %arg8: memref<12x128xf32, #tpu.memory_space<vmem>>, %arg9: memref<2x256xf32, #tpu.memory_space<vmem>>, %arg10: memref<2x128xf32, #tpu.memory_space<vmem>>) attributes {dimension_semantics = [#tpu.dimension_semantics<arbitrary>], iteration_bounds = array<i64: 1>, scalar_prefetch = 0 : i64, scratch_operands = 0 : i64, tpu.core_type = #tpu.core_type<tc>, window_params = [{pipeline_mode = #tpu.pipeline_mode<synchronous>, transform_indices = @transform_0, window_bounds = array<i64: 16, 48>}, {pipeline_mode = #tpu.pipeline_mode<synchronous>, transform_indices = @transform_1, window_bounds = array<i64: 16, 16>}, {pipeline_mode = #tpu.pipeline_mode<synchronous>, transform_indices = @transform_2, window_bounds = array<i64: 2, 144>}, {pipeline_mode = #tpu.pipeline_mode<synchronous>, transform_indices = @transform_3, window_bounds = array<i64: 48, 128>}, {pipeline_mode = #tpu.pipeline_mode<synchronous>, transform_indices = @transform_4, window_bounds = array<i64: 2, 128, 768>}, {pipeline_mode = #tpu.pipeline_mode<synchronous>, transform_indices = @transform_5, window_bounds = array<i64: 2, 256, 128>}, {pipeline_mode = #tpu.pipeline_mode<synchronous>, transform_indices = @transform_6, window_bounds = array<i64: 128, 256>}, {pipeline_mode = #tpu.pipeline_mode<synchronous>, transform_indices = @transform_7, window_bounds = array<i64: 12, 128>}, {pipeline_mode = #tpu.pipeline_mode<synchronous>, transform_indices = @transform_8, window_bounds = array<i64: 2, 256>}, {pipeline_mode = #tpu.pipeline_mode<synchronous>, transform_indices = @transform_9, window_bounds = array<i64: 2, 128>}]} {
    %c0 = arith.constant 0 : index
    %c0_0 = arith.constant 0 : index
    %0 = vector.load %arg8[%c0, %c0_0] : memref<12x128xf32, #tpu.memory_space<vmem>>, vector<12x128xf32>
    %c0_1 = arith.constant 0 : index
    %c0_2 = arith.constant 0 : index
    %1 = vector.load %arg9[%c0_1, %c0_2] : memref<2x256xf32, #tpu.memory_space<vmem>>, vector<2x256xf32>
    %c0_3 = arith.constant 0 : index
    %c0_4 = arith.constant 0 : index
    %2 = vector.load %arg2[%c0_3, %c0_4] : memref<16x16xf32, #tpu.memory_space<vmem>>, vector<16x16xf32>
    %3 = tpu.iota {dimensions = array<i32: 1>} : vector<1x128xi32>
    %c0_i32 = arith.constant 0 : i32
    %4 = vector.broadcast %c0_i32 : i32 to vector<1x128xi32>
    %5 = arith.cmpi sge, %3, %4 : vector<1x128xi32>
    %c64_i32 = arith.constant 64 : i32
    %6 = vector.broadcast %c64_i32 : i32 to vector<1x128xi32>
    %7 = arith.cmpi slt, %3, %6 : vector<1x128xi32>
    %8 = arith.andi %5, %7 : vector<1x128xi1>
    %9 = arith.extui %8 : vector<1x128xi1> to vector<1x128xi32>
    %10 = arith.sitofp %9 : vector<1x128xi32> to vector<1x128xf32>
    %c64_i32_5 = arith.constant 64 : i32
    %11 = vector.broadcast %c64_i32_5 : i32 to vector<1x128xi32>
    %12 = arith.cmpi sge, %3, %11 : vector<1x128xi32>
    %c128_i32 = arith.constant 128 : i32
    %13 = vector.broadcast %c128_i32 : i32 to vector<1x128xi32>
    %14 = arith.cmpi slt, %3, %13 : vector<1x128xi32>
    %15 = arith.andi %12, %14 : vector<1x128xi1>
    %16 = arith.extui %15 : vector<1x128xi1> to vector<1x128xi32>
    %17 = arith.sitofp %16 : vector<1x128xi32> to vector<1x128xf32>
    %c0_6 = arith.constant 0 : index
    %c0_7 = arith.constant 0 : index
    %18 = vector.load %arg1[%c0_6, %c0_7] : memref<16x48xf32, #tpu.memory_space<vmem>>, vector<16x48xf32>
    %c0_8 = arith.constant 0 : index
    %c0_9 = arith.constant 0 : index
    %19 = vector.load %arg4[%c0_8, %c0_9] : memref<48x128xf32, #tpu.memory_space<vmem>>, vector<48x128xf32>
    %cst = arith.constant dense<0.000000e+00> : vector<16x128xf32>
    %20 = tpu.matmul %18, %19, %cst {dimension_numbers = #tpu.dot_dimension_numbers<[1], [0], [0], [1], [0, 0, 1, 1], [], []>} : vector<16x48xf32>, vector<48x128xf32>, vector<16x128xf32> -> vector<16x128xf32>
    %21 = vector.extract_strided_slice %0 {offsets = [0, 0], sizes = [1, 128], strides = [1, 1]} : vector<12x128xf32> to vector<1x128xf32>
    %22 = vector.extract_strided_slice %0 {offsets = [1, 0], sizes = [1, 128], strides = [1, 1]} : vector<12x128xf32> to vector<1x128xf32>
    %cst_10 = arith.constant dense<0.000000e+00> : vector<16xf32>
    %23 = vector.multi_reduction <add>, %20, %cst_10 [1] : vector<16x128xf32> to vector<16xf32>
    %24 = vector.shape_cast %23 : vector<16xf32> to vector<16x1xf32>
    %25 = arith.mulf %20, %20 : vector<16x128xf32>
    %cst_11 = arith.constant dense<0.000000e+00> : vector<16xf32>
    %26 = vector.multi_reduction <add>, %25, %cst_11 [1] : vector<16x128xf32> to vector<16xf32>
    %27 = vector.shape_cast %26 : vector<16xf32> to vector<16x1xf32>
    %cst_12 = arith.constant 7.812500e-03 : f32
    %28 = vector.broadcast %cst_12 : f32 to vector<16x1xf32>
    %29 = arith.mulf %24, %28 : vector<16x1xf32>
    %cst_13 = arith.constant 7.812500e-03 : f32
    %30 = vector.broadcast %cst_13 : f32 to vector<16x1xf32>
    %31 = arith.mulf %27, %30 : vector<16x1xf32>
    %32 = arith.mulf %29, %29 : vector<16x1xf32>
    %33 = arith.subf %31, %32 : vector<16x1xf32>
    %34 = vector.broadcast %29 : vector<16x1xf32> to vector<16x128xf32>
    %35 = arith.subf %20, %34 : vector<16x128xf32>
    %cst_14 = arith.constant 9.99999997E-7 : f32
    %36 = vector.broadcast %cst_14 : f32 to vector<16x1xf32>
    %37 = arith.addf %33, %36 : vector<16x1xf32>
    %38 = math.rsqrt %37 : vector<16x1xf32>
    %39 = vector.broadcast %38 : vector<16x1xf32> to vector<16x128xf32>
    %40 = arith.mulf %35, %39 : vector<16x128xf32>
    %41 = vector.broadcast %21 : vector<1x128xf32> to vector<16x128xf32>
    %42 = arith.mulf %40, %41 : vector<16x128xf32>
    %43 = vector.broadcast %22 : vector<1x128xf32> to vector<16x128xf32>
    %44 = arith.addf %42, %43 : vector<16x128xf32>
    %c0_15 = arith.constant 0 : index
    %c0_16 = arith.constant 0 : index
    %c0_17 = arith.constant 0 : index
    %45 = vector.load %arg5[%c0_15, %c0_16, %c0_17] : memref<2x128x768xbf16, #tpu.memory_space<vmem>>, vector<1x128x768xbf16>
    %46 = vector.shape_cast %45 : vector<1x128x768xbf16> to vector<128x768xbf16>
    %47 = arith.truncf %44 : vector<16x128xf32> to vector<16x128xbf16>
    %48 = vector.extract_strided_slice %46 {offsets = [0, 0], sizes = [128, 384], strides = [1, 1]} : vector<128x768xbf16> to vector<128x384xbf16>
    %cst_18 = arith.constant dense<0.000000e+00> : vector<16x384xf32>
    %49 = tpu.matmul %47, %48, %cst_18 {dimension_numbers = #tpu.dot_dimension_numbers<[1], [0], [0], [1], [0, 0, 1, 1], [], []>} : vector<16x128xbf16>, vector<128x384xbf16>, vector<16x384xf32> -> vector<16x384xf32>
    %50 = vector.extract_strided_slice %49 {offsets = [0, 0], sizes = [16, 128], strides = [1, 1]} : vector<16x384xf32> to vector<16x128xf32>
    %51 = vector.extract_strided_slice %49 {offsets = [0, 128], sizes = [16, 128], strides = [1, 1]} : vector<16x384xf32> to vector<16x128xf32>
    %52 = arith.truncf %51 : vector<16x128xf32> to vector<16x128xbf16>
    %53 = vector.extract_strided_slice %49 {offsets = [0, 256], sizes = [16, 128], strides = [1, 1]} : vector<16x384xf32> to vector<16x128xf32>
    %54 = arith.truncf %53 : vector<16x128xf32> to vector<16x128xbf16>
    %55 = vector.extract_strided_slice %46 {offsets = [0, 384], sizes = [128, 128], strides = [1, 1]} : vector<128x768xbf16> to vector<128x128xbf16>
    %56 = vector.extract_strided_slice %46 {offsets = [0, 512], sizes = [128, 256], strides = [1, 1]} : vector<128x768xbf16> to vector<128x256xbf16>
    %57 = vector.broadcast %10 : vector<1x128xf32> to vector<16x128xf32>
    %58 = arith.mulf %50, %57 : vector<16x128xf32>
    %59 = arith.truncf %58 : vector<16x128xf32> to vector<16x128xbf16>
    %cst_19 = arith.constant dense<0.000000e+00> : vector<16x16xf32>
    %60 = tpu.matmul %59, %52, %cst_19 {dimension_numbers = #tpu.dot_dimension_numbers<[1], [1], [0], [0], [0, 0, 1, 0], [], []>} : vector<16x128xbf16>, vector<16x128xbf16>, vector<16x16xf32> -> vector<16x16xf32>
    %61 = arith.addf %60, %2 : vector<16x16xf32>
    %cst_20 = arith.constant dense<0xFF800000> : vector<16xf32>
    %62 = vector.multi_reduction <maximumf>, %61, %cst_20 [1] : vector<16x16xf32> to vector<16xf32>
    %63 = vector.shape_cast %62 : vector<16xf32> to vector<16x1xf32>
    %64 = vector.broadcast %63 : vector<16x1xf32> to vector<16x16xf32>
    %65 = arith.subf %61, %64 : vector<16x16xf32>
    %66 = math.exp %65 : vector<16x16xf32>
    %cst_21 = arith.constant dense<0.000000e+00> : vector<16xf32>
    %67 = vector.multi_reduction <add>, %66, %cst_21 [1] : vector<16x16xf32> to vector<16xf32>
    %68 = vector.shape_cast %67 : vector<16xf32> to vector<16x1xf32>
    %69 = tpu.reciprocal %68 {approx = true} : vector<16x1xf32> -> vector<16x1xf32>
    %70 = vector.broadcast %69 : vector<16x1xf32> to vector<16x16xf32>
    %71 = arith.mulf %66, %70 : vector<16x16xf32>
    %72 = arith.truncf %71 : vector<16x16xf32> to vector<16x16xbf16>
    %cst_22 = arith.constant dense<0.000000e+00> : vector<16x128xf32>
    %73 = tpu.matmul %72, %54, %cst_22 {dimension_numbers = #tpu.dot_dimension_numbers<[1], [0], [0], [1], [0, 0, 1, 1], [], []>} : vector<16x16xbf16>, vector<16x128xbf16>, vector<16x128xf32> -> vector<16x128xf32>
    %74 = vector.broadcast %10 : vector<1x128xf32> to vector<16x128xf32>
    %75 = arith.mulf %73, %74 : vector<16x128xf32>
    %76 = arith.truncf %75 : vector<16x128xf32> to vector<16x128xbf16>
    %cst_23 = arith.constant dense<0.000000e+00> : vector<16x128xf32>
    %77 = tpu.matmul %76, %55, %cst_23 {dimension_numbers = #tpu.dot_dimension_numbers<[1], [0], [0], [1], [0, 0, 1, 1], [], []>} : vector<16x128xbf16>, vector<128x128xbf16>, vector<16x128xf32> -> vector<16x128xf32>
    %78 = vector.broadcast %17 : vector<1x128xf32> to vector<16x128xf32>
    %79 = arith.mulf %50, %78 : vector<16x128xf32>
    %80 = arith.truncf %79 : vector<16x128xf32> to vector<16x128xbf16>
    %cst_24 = arith.constant dense<0.000000e+00> : vector<16x16xf32>
    %81 = tpu.matmul %80, %52, %cst_24 {dimension_numbers = #tpu.dot_dimension_numbers<[1], [1], [0], [0], [0, 0, 1, 0], [], []>} : vector<16x128xbf16>, vector<16x128xbf16>, vector<16x16xf32> -> vector<16x16xf32>
    %82 = arith.addf %81, %2 : vector<16x16xf32>
    %cst_25 = arith.constant dense<0xFF800000> : vector<16xf32>
    %83 = vector.multi_reduction <maximumf>, %82, %cst_25 [1] : vector<16x16xf32> to vector<16xf32>
    %84 = vector.shape_cast %83 : vector<16xf32> to vector<16x1xf32>
    %85 = vector.broadcast %84 : vector<16x1xf32> to vector<16x16xf32>
    %86 = arith.subf %82, %85 : vector<16x16xf32>
    %87 = math.exp %86 : vector<16x16xf32>
    %cst_26 = arith.constant dense<0.000000e+00> : vector<16xf32>
    %88 = vector.multi_reduction <add>, %87, %cst_26 [1] : vector<16x16xf32> to vector<16xf32>
    %89 = vector.shape_cast %88 : vector<16xf32> to vector<16x1xf32>
    %90 = tpu.reciprocal %89 {approx = true} : vector<16x1xf32> -> vector<16x1xf32>
    %91 = vector.broadcast %90 : vector<16x1xf32> to vector<16x16xf32>
    %92 = arith.mulf %87, %91 : vector<16x16xf32>
    %93 = arith.truncf %92 : vector<16x16xf32> to vector<16x16xbf16>
    %cst_27 = arith.constant dense<0.000000e+00> : vector<16x128xf32>
    %94 = tpu.matmul %93, %54, %cst_27 {dimension_numbers = #tpu.dot_dimension_numbers<[1], [0], [0], [1], [0, 0, 1, 1], [], []>} : vector<16x16xbf16>, vector<16x128xbf16>, vector<16x128xf32> -> vector<16x128xf32>
    %95 = vector.broadcast %17 : vector<1x128xf32> to vector<16x128xf32>
    %96 = arith.mulf %94, %95 : vector<16x128xf32>
    %97 = arith.truncf %96 : vector<16x128xf32> to vector<16x128xbf16>
    %cst_28 = arith.constant dense<0.000000e+00> : vector<16x128xf32>
    %98 = tpu.matmul %97, %55, %cst_28 {dimension_numbers = #tpu.dot_dimension_numbers<[1], [0], [0], [1], [0, 0, 1, 1], [], []>} : vector<16x128xbf16>, vector<128x128xbf16>, vector<16x128xf32> -> vector<16x128xf32>
    %99 = arith.addf %77, %98 : vector<16x128xf32>
    %100 = arith.addf %99, %44 : vector<16x128xf32>
    %101 = vector.extract_strided_slice %0 {offsets = [2, 0], sizes = [1, 128], strides = [1, 1]} : vector<12x128xf32> to vector<1x128xf32>
    %102 = vector.extract_strided_slice %0 {offsets = [3, 0], sizes = [1, 128], strides = [1, 1]} : vector<12x128xf32> to vector<1x128xf32>
    %cst_29 = arith.constant dense<0.000000e+00> : vector<16xf32>
    %103 = vector.multi_reduction <add>, %100, %cst_29 [1] : vector<16x128xf32> to vector<16xf32>
    %104 = vector.shape_cast %103 : vector<16xf32> to vector<16x1xf32>
    %105 = arith.mulf %100, %100 : vector<16x128xf32>
    %cst_30 = arith.constant dense<0.000000e+00> : vector<16xf32>
    %106 = vector.multi_reduction <add>, %105, %cst_30 [1] : vector<16x128xf32> to vector<16xf32>
    %107 = vector.shape_cast %106 : vector<16xf32> to vector<16x1xf32>
    %cst_31 = arith.constant 7.812500e-03 : f32
    %108 = vector.broadcast %cst_31 : f32 to vector<16x1xf32>
    %109 = arith.mulf %104, %108 : vector<16x1xf32>
    %cst_32 = arith.constant 7.812500e-03 : f32
    %110 = vector.broadcast %cst_32 : f32 to vector<16x1xf32>
    %111 = arith.mulf %107, %110 : vector<16x1xf32>
    %112 = arith.mulf %109, %109 : vector<16x1xf32>
    %113 = arith.subf %111, %112 : vector<16x1xf32>
    %114 = vector.broadcast %109 : vector<16x1xf32> to vector<16x128xf32>
    %115 = arith.subf %100, %114 : vector<16x128xf32>
    %cst_33 = arith.constant 9.99999997E-7 : f32
    %116 = vector.broadcast %cst_33 : f32 to vector<16x1xf32>
    %117 = arith.addf %113, %116 : vector<16x1xf32>
    %118 = math.rsqrt %117 : vector<16x1xf32>
    %119 = vector.broadcast %118 : vector<16x1xf32> to vector<16x128xf32>
    %120 = arith.mulf %115, %119 : vector<16x128xf32>
    %121 = vector.broadcast %101 : vector<1x128xf32> to vector<16x128xf32>
    %122 = arith.mulf %120, %121 : vector<16x128xf32>
    %123 = vector.broadcast %102 : vector<1x128xf32> to vector<16x128xf32>
    %124 = arith.addf %122, %123 : vector<16x128xf32>
    %125 = arith.truncf %124 : vector<16x128xf32> to vector<16x128xbf16>
    %cst_34 = arith.constant dense<0.000000e+00> : vector<16x256xf32>
    %126 = tpu.matmul %125, %56, %cst_34 {dimension_numbers = #tpu.dot_dimension_numbers<[1], [0], [0], [1], [0, 0, 1, 1], [], []>} : vector<16x128xbf16>, vector<128x256xbf16>, vector<16x256xf32> -> vector<16x256xf32>
    %127 = vector.extract_strided_slice %1 {offsets = [0, 0], sizes = [1, 256], strides = [1, 1]} : vector<2x256xf32> to vector<1x256xf32>
    %128 = vector.broadcast %127 : vector<1x256xf32> to vector<16x256xf32>
    %129 = arith.addf %126, %128 : vector<16x256xf32>
    %cst_35 = arith.constant 0.000000e+00 : f32
    %130 = vector.broadcast %cst_35 : f32 to vector<16x256xf32>
    %131 = arith.maximumf %129, %130 : vector<16x256xf32>
    %132 = arith.truncf %131 : vector<16x256xf32> to vector<16x256xbf16>
    %c0_36 = arith.constant 0 : index
    %c0_37 = arith.constant 0 : index
    %c0_38 = arith.constant 0 : index
    %133 = vector.load %arg6[%c0_36, %c0_37, %c0_38] : memref<2x256x128xbf16, #tpu.memory_space<vmem>>, vector<1x256x128xbf16>
    %134 = vector.shape_cast %133 : vector<1x256x128xbf16> to vector<256x128xbf16>
    %cst_39 = arith.constant dense<0.000000e+00> : vector<16x128xf32>
    %135 = tpu.matmul %132, %134, %cst_39 {dimension_numbers = #tpu.dot_dimension_numbers<[1], [0], [0], [1], [0, 0, 1, 1], [], []>} : vector<16x256xbf16>, vector<256x128xbf16>, vector<16x128xf32> -> vector<16x128xf32>
    %136 = vector.extract_strided_slice %0 {offsets = [6, 0], sizes = [1, 128], strides = [1, 1]} : vector<12x128xf32> to vector<1x128xf32>
    %137 = vector.broadcast %136 : vector<1x128xf32> to vector<16x128xf32>
    %138 = arith.addf %135, %137 : vector<16x128xf32>
    %139 = arith.addf %138, %124 : vector<16x128xf32>
    %140 = vector.extract_strided_slice %0 {offsets = [4, 0], sizes = [1, 128], strides = [1, 1]} : vector<12x128xf32> to vector<1x128xf32>
    %141 = vector.extract_strided_slice %0 {offsets = [5, 0], sizes = [1, 128], strides = [1, 1]} : vector<12x128xf32> to vector<1x128xf32>
    %cst_40 = arith.constant dense<0.000000e+00> : vector<16xf32>
    %142 = vector.multi_reduction <add>, %139, %cst_40 [1] : vector<16x128xf32> to vector<16xf32>
    %143 = vector.shape_cast %142 : vector<16xf32> to vector<16x1xf32>
    %144 = arith.mulf %139, %139 : vector<16x128xf32>
    %cst_41 = arith.constant dense<0.000000e+00> : vector<16xf32>
    %145 = vector.multi_reduction <add>, %144, %cst_41 [1] : vector<16x128xf32> to vector<16xf32>
    %146 = vector.shape_cast %145 : vector<16xf32> to vector<16x1xf32>
    %cst_42 = arith.constant 7.812500e-03 : f32
    %147 = vector.broadcast %cst_42 : f32 to vector<16x1xf32>
    %148 = arith.mulf %143, %147 : vector<16x1xf32>
    %cst_43 = arith.constant 7.812500e-03 : f32
    %149 = vector.broadcast %cst_43 : f32 to vector<16x1xf32>
    %150 = arith.mulf %146, %149 : vector<16x1xf32>
    %151 = arith.mulf %148, %148 : vector<16x1xf32>
    %152 = arith.subf %150, %151 : vector<16x1xf32>
    %153 = vector.broadcast %148 : vector<16x1xf32> to vector<16x128xf32>
    %154 = arith.subf %139, %153 : vector<16x128xf32>
    %cst_44 = arith.constant 9.99999997E-7 : f32
    %155 = vector.broadcast %cst_44 : f32 to vector<16x1xf32>
    %156 = arith.addf %152, %155 : vector<16x1xf32>
    %157 = math.rsqrt %156 : vector<16x1xf32>
    %158 = vector.broadcast %157 : vector<16x1xf32> to vector<16x128xf32>
    %159 = arith.mulf %154, %158 : vector<16x128xf32>
    %160 = vector.broadcast %140 : vector<1x128xf32> to vector<16x128xf32>
    %161 = arith.mulf %159, %160 : vector<16x128xf32>
    %162 = vector.broadcast %141 : vector<1x128xf32> to vector<16x128xf32>
    %163 = arith.addf %161, %162 : vector<16x128xf32>
    %c1 = arith.constant 1 : index
    %c0_45 = arith.constant 0 : index
    %c0_46 = arith.constant 0 : index
    %164 = vector.load %arg5[%c1, %c0_45, %c0_46] : memref<2x128x768xbf16, #tpu.memory_space<vmem>>, vector<1x128x768xbf16>
    %165 = vector.shape_cast %164 : vector<1x128x768xbf16> to vector<128x768xbf16>
    %166 = arith.truncf %163 : vector<16x128xf32> to vector<16x128xbf16>
    %167 = vector.extract_strided_slice %165 {offsets = [0, 0], sizes = [128, 384], strides = [1, 1]} : vector<128x768xbf16> to vector<128x384xbf16>
    %cst_47 = arith.constant dense<0.000000e+00> : vector<16x384xf32>
    %168 = tpu.matmul %166, %167, %cst_47 {dimension_numbers = #tpu.dot_dimension_numbers<[1], [0], [0], [1], [0, 0, 1, 1], [], []>} : vector<16x128xbf16>, vector<128x384xbf16>, vector<16x384xf32> -> vector<16x384xf32>
    %169 = vector.extract_strided_slice %168 {offsets = [0, 0], sizes = [16, 128], strides = [1, 1]} : vector<16x384xf32> to vector<16x128xf32>
    %170 = vector.extract_strided_slice %168 {offsets = [0, 128], sizes = [16, 128], strides = [1, 1]} : vector<16x384xf32> to vector<16x128xf32>
    %171 = arith.truncf %170 : vector<16x128xf32> to vector<16x128xbf16>
    %172 = vector.extract_strided_slice %168 {offsets = [0, 256], sizes = [16, 128], strides = [1, 1]} : vector<16x384xf32> to vector<16x128xf32>
    %173 = arith.truncf %172 : vector<16x128xf32> to vector<16x128xbf16>
    %174 = vector.extract_strided_slice %165 {offsets = [0, 384], sizes = [128, 128], strides = [1, 1]} : vector<128x768xbf16> to vector<128x128xbf16>
    %175 = vector.extract_strided_slice %165 {offsets = [0, 512], sizes = [128, 256], strides = [1, 1]} : vector<128x768xbf16> to vector<128x256xbf16>
    %176 = vector.broadcast %10 : vector<1x128xf32> to vector<16x128xf32>
    %177 = arith.mulf %169, %176 : vector<16x128xf32>
    %178 = arith.truncf %177 : vector<16x128xf32> to vector<16x128xbf16>
    %cst_48 = arith.constant dense<0.000000e+00> : vector<16x16xf32>
    %179 = tpu.matmul %178, %171, %cst_48 {dimension_numbers = #tpu.dot_dimension_numbers<[1], [1], [0], [0], [0, 0, 1, 0], [], []>} : vector<16x128xbf16>, vector<16x128xbf16>, vector<16x16xf32> -> vector<16x16xf32>
    %180 = arith.addf %179, %2 : vector<16x16xf32>
    %cst_49 = arith.constant dense<0xFF800000> : vector<16xf32>
    %181 = vector.multi_reduction <maximumf>, %180, %cst_49 [1] : vector<16x16xf32> to vector<16xf32>
    %182 = vector.shape_cast %181 : vector<16xf32> to vector<16x1xf32>
    %183 = vector.broadcast %182 : vector<16x1xf32> to vector<16x16xf32>
    %184 = arith.subf %180, %183 : vector<16x16xf32>
    %185 = math.exp %184 : vector<16x16xf32>
    %cst_50 = arith.constant dense<0.000000e+00> : vector<16xf32>
    %186 = vector.multi_reduction <add>, %185, %cst_50 [1] : vector<16x16xf32> to vector<16xf32>
    %187 = vector.shape_cast %186 : vector<16xf32> to vector<16x1xf32>
    %188 = tpu.reciprocal %187 {approx = true} : vector<16x1xf32> -> vector<16x1xf32>
    %189 = vector.broadcast %188 : vector<16x1xf32> to vector<16x16xf32>
    %190 = arith.mulf %185, %189 : vector<16x16xf32>
    %191 = arith.truncf %190 : vector<16x16xf32> to vector<16x16xbf16>
    %cst_51 = arith.constant dense<0.000000e+00> : vector<16x128xf32>
    %192 = tpu.matmul %191, %173, %cst_51 {dimension_numbers = #tpu.dot_dimension_numbers<[1], [0], [0], [1], [0, 0, 1, 1], [], []>} : vector<16x16xbf16>, vector<16x128xbf16>, vector<16x128xf32> -> vector<16x128xf32>
    %193 = vector.broadcast %10 : vector<1x128xf32> to vector<16x128xf32>
    %194 = arith.mulf %192, %193 : vector<16x128xf32>
    %195 = arith.truncf %194 : vector<16x128xf32> to vector<16x128xbf16>
    %cst_52 = arith.constant dense<0.000000e+00> : vector<16x128xf32>
    %196 = tpu.matmul %195, %174, %cst_52 {dimension_numbers = #tpu.dot_dimension_numbers<[1], [0], [0], [1], [0, 0, 1, 1], [], []>} : vector<16x128xbf16>, vector<128x128xbf16>, vector<16x128xf32> -> vector<16x128xf32>
    %197 = vector.broadcast %17 : vector<1x128xf32> to vector<16x128xf32>
    %198 = arith.mulf %169, %197 : vector<16x128xf32>
    %199 = arith.truncf %198 : vector<16x128xf32> to vector<16x128xbf16>
    %cst_53 = arith.constant dense<0.000000e+00> : vector<16x16xf32>
    %200 = tpu.matmul %199, %171, %cst_53 {dimension_numbers = #tpu.dot_dimension_numbers<[1], [1], [0], [0], [0, 0, 1, 0], [], []>} : vector<16x128xbf16>, vector<16x128xbf16>, vector<16x16xf32> -> vector<16x16xf32>
    %201 = arith.addf %200, %2 : vector<16x16xf32>
    %cst_54 = arith.constant dense<0xFF800000> : vector<16xf32>
    %202 = vector.multi_reduction <maximumf>, %201, %cst_54 [1] : vector<16x16xf32> to vector<16xf32>
    %203 = vector.shape_cast %202 : vector<16xf32> to vector<16x1xf32>
    %204 = vector.broadcast %203 : vector<16x1xf32> to vector<16x16xf32>
    %205 = arith.subf %201, %204 : vector<16x16xf32>
    %206 = math.exp %205 : vector<16x16xf32>
    %cst_55 = arith.constant dense<0.000000e+00> : vector<16xf32>
    %207 = vector.multi_reduction <add>, %206, %cst_55 [1] : vector<16x16xf32> to vector<16xf32>
    %208 = vector.shape_cast %207 : vector<16xf32> to vector<16x1xf32>
    %209 = tpu.reciprocal %208 {approx = true} : vector<16x1xf32> -> vector<16x1xf32>
    %210 = vector.broadcast %209 : vector<16x1xf32> to vector<16x16xf32>
    %211 = arith.mulf %206, %210 : vector<16x16xf32>
    %212 = arith.truncf %211 : vector<16x16xf32> to vector<16x16xbf16>
    %cst_56 = arith.constant dense<0.000000e+00> : vector<16x128xf32>
    %213 = tpu.matmul %212, %173, %cst_56 {dimension_numbers = #tpu.dot_dimension_numbers<[1], [0], [0], [1], [0, 0, 1, 1], [], []>} : vector<16x16xbf16>, vector<16x128xbf16>, vector<16x128xf32> -> vector<16x128xf32>
    %214 = vector.broadcast %17 : vector<1x128xf32> to vector<16x128xf32>
    %215 = arith.mulf %213, %214 : vector<16x128xf32>
    %216 = arith.truncf %215 : vector<16x128xf32> to vector<16x128xbf16>
    %cst_57 = arith.constant dense<0.000000e+00> : vector<16x128xf32>
    %217 = tpu.matmul %216, %174, %cst_57 {dimension_numbers = #tpu.dot_dimension_numbers<[1], [0], [0], [1], [0, 0, 1, 1], [], []>} : vector<16x128xbf16>, vector<128x128xbf16>, vector<16x128xf32> -> vector<16x128xf32>
    %218 = arith.addf %196, %217 : vector<16x128xf32>
    %219 = arith.addf %218, %163 : vector<16x128xf32>
    %220 = vector.extract_strided_slice %0 {offsets = [7, 0], sizes = [1, 128], strides = [1, 1]} : vector<12x128xf32> to vector<1x128xf32>
    %221 = vector.extract_strided_slice %0 {offsets = [8, 0], sizes = [1, 128], strides = [1, 1]} : vector<12x128xf32> to vector<1x128xf32>
    %cst_58 = arith.constant dense<0.000000e+00> : vector<16xf32>
    %222 = vector.multi_reduction <add>, %219, %cst_58 [1] : vector<16x128xf32> to vector<16xf32>
    %223 = vector.shape_cast %222 : vector<16xf32> to vector<16x1xf32>
    %224 = arith.mulf %219, %219 : vector<16x128xf32>
    %cst_59 = arith.constant dense<0.000000e+00> : vector<16xf32>
    %225 = vector.multi_reduction <add>, %224, %cst_59 [1] : vector<16x128xf32> to vector<16xf32>
    %226 = vector.shape_cast %225 : vector<16xf32> to vector<16x1xf32>
    %cst_60 = arith.constant 7.812500e-03 : f32
    %227 = vector.broadcast %cst_60 : f32 to vector<16x1xf32>
    %228 = arith.mulf %223, %227 : vector<16x1xf32>
    %cst_61 = arith.constant 7.812500e-03 : f32
    %229 = vector.broadcast %cst_61 : f32 to vector<16x1xf32>
    %230 = arith.mulf %226, %229 : vector<16x1xf32>
    %231 = arith.mulf %228, %228 : vector<16x1xf32>
    %232 = arith.subf %230, %231 : vector<16x1xf32>
    %233 = vector.broadcast %228 : vector<16x1xf32> to vector<16x128xf32>
    %234 = arith.subf %219, %233 : vector<16x128xf32>
    %cst_62 = arith.constant 9.99999997E-7 : f32
    %235 = vector.broadcast %cst_62 : f32 to vector<16x1xf32>
    %236 = arith.addf %232, %235 : vector<16x1xf32>
    %237 = math.rsqrt %236 : vector<16x1xf32>
    %238 = vector.broadcast %237 : vector<16x1xf32> to vector<16x128xf32>
    %239 = arith.mulf %234, %238 : vector<16x128xf32>
    %240 = vector.broadcast %220 : vector<1x128xf32> to vector<16x128xf32>
    %241 = arith.mulf %239, %240 : vector<16x128xf32>
    %242 = vector.broadcast %221 : vector<1x128xf32> to vector<16x128xf32>
    %243 = arith.addf %241, %242 : vector<16x128xf32>
    %244 = arith.truncf %243 : vector<16x128xf32> to vector<16x128xbf16>
    %cst_63 = arith.constant dense<0.000000e+00> : vector<16x256xf32>
    %245 = tpu.matmul %244, %175, %cst_63 {dimension_numbers = #tpu.dot_dimension_numbers<[1], [0], [0], [1], [0, 0, 1, 1], [], []>} : vector<16x128xbf16>, vector<128x256xbf16>, vector<16x256xf32> -> vector<16x256xf32>
    %246 = vector.extract_strided_slice %1 {offsets = [1, 0], sizes = [1, 256], strides = [1, 1]} : vector<2x256xf32> to vector<1x256xf32>
    %247 = vector.broadcast %246 : vector<1x256xf32> to vector<16x256xf32>
    %248 = arith.addf %245, %247 : vector<16x256xf32>
    %cst_64 = arith.constant 0.000000e+00 : f32
    %249 = vector.broadcast %cst_64 : f32 to vector<16x256xf32>
    %250 = arith.maximumf %248, %249 : vector<16x256xf32>
    %251 = arith.truncf %250 : vector<16x256xf32> to vector<16x256xbf16>
    %c1_65 = arith.constant 1 : index
    %c0_66 = arith.constant 0 : index
    %c0_67 = arith.constant 0 : index
    %252 = vector.load %arg6[%c1_65, %c0_66, %c0_67] : memref<2x256x128xbf16, #tpu.memory_space<vmem>>, vector<1x256x128xbf16>
    %253 = vector.shape_cast %252 : vector<1x256x128xbf16> to vector<256x128xbf16>
    %cst_68 = arith.constant dense<0.000000e+00> : vector<16x128xf32>
    %254 = tpu.matmul %251, %253, %cst_68 {dimension_numbers = #tpu.dot_dimension_numbers<[1], [0], [0], [1], [0, 0, 1, 1], [], []>} : vector<16x256xbf16>, vector<256x128xbf16>, vector<16x128xf32> -> vector<16x128xf32>
    %255 = vector.extract_strided_slice %0 {offsets = [11, 0], sizes = [1, 128], strides = [1, 1]} : vector<12x128xf32> to vector<1x128xf32>
    %256 = vector.broadcast %255 : vector<1x128xf32> to vector<16x128xf32>
    %257 = arith.addf %254, %256 : vector<16x128xf32>
    %258 = arith.addf %257, %243 : vector<16x128xf32>
    %259 = vector.extract_strided_slice %0 {offsets = [9, 0], sizes = [1, 128], strides = [1, 1]} : vector<12x128xf32> to vector<1x128xf32>
    %260 = vector.extract_strided_slice %0 {offsets = [10, 0], sizes = [1, 128], strides = [1, 1]} : vector<12x128xf32> to vector<1x128xf32>
    %cst_69 = arith.constant dense<0.000000e+00> : vector<16xf32>
    %261 = vector.multi_reduction <add>, %258, %cst_69 [1] : vector<16x128xf32> to vector<16xf32>
    %262 = vector.shape_cast %261 : vector<16xf32> to vector<16x1xf32>
    %263 = arith.mulf %258, %258 : vector<16x128xf32>
    %cst_70 = arith.constant dense<0.000000e+00> : vector<16xf32>
    %264 = vector.multi_reduction <add>, %263, %cst_70 [1] : vector<16x128xf32> to vector<16xf32>
    %265 = vector.shape_cast %264 : vector<16xf32> to vector<16x1xf32>
    %cst_71 = arith.constant 7.812500e-03 : f32
    %266 = vector.broadcast %cst_71 : f32 to vector<16x1xf32>
    %267 = arith.mulf %262, %266 : vector<16x1xf32>
    %cst_72 = arith.constant 7.812500e-03 : f32
    %268 = vector.broadcast %cst_72 : f32 to vector<16x1xf32>
    %269 = arith.mulf %265, %268 : vector<16x1xf32>
    %270 = arith.mulf %267, %267 : vector<16x1xf32>
    %271 = arith.subf %269, %270 : vector<16x1xf32>
    %272 = vector.broadcast %267 : vector<16x1xf32> to vector<16x128xf32>
    %273 = arith.subf %258, %272 : vector<16x128xf32>
    %cst_73 = arith.constant 9.99999997E-7 : f32
    %274 = vector.broadcast %cst_73 : f32 to vector<16x1xf32>
    %275 = arith.addf %271, %274 : vector<16x1xf32>
    %276 = math.rsqrt %275 : vector<16x1xf32>
    %277 = vector.broadcast %276 : vector<16x1xf32> to vector<16x128xf32>
    %278 = arith.mulf %273, %277 : vector<16x128xf32>
    %279 = vector.broadcast %259 : vector<1x128xf32> to vector<16x128xf32>
    %280 = arith.mulf %278, %279 : vector<16x128xf32>
    %281 = vector.broadcast %260 : vector<1x128xf32> to vector<16x128xf32>
    %282 = arith.addf %280, %281 : vector<16x128xf32>
    %c0_74 = arith.constant 0 : index
    %c0_75 = arith.constant 0 : index
    %283 = vector.load %arg3[%c0_74, %c0_75] : memref<2x144xf32, #tpu.memory_space<vmem>>, vector<2x144xf32>
    %284 = vector.extract_strided_slice %283 {offsets = [0, 0], sizes = [2, 128], strides = [1, 1]} : vector<2x144xf32> to vector<2x128xf32>
    %285 = vector.extract_strided_slice %283 {offsets = [0, 128], sizes = [2, 16], strides = [1, 1]} : vector<2x144xf32> to vector<2x16xf32>
    %cst_76 = arith.constant dense<0.000000e+00> : vector<2x128xf32>
    %286 = tpu.matmul %285, %282, %cst_76 {dimension_numbers = #tpu.dot_dimension_numbers<[1], [0], [0], [1], [0, 0, 1, 1], [], []>} : vector<2x16xf32>, vector<16x128xf32>, vector<2x128xf32> -> vector<2x128xf32>
    %287 = arith.truncf %286 : vector<2x128xf32> to vector<2x128xbf16>
    %c0_77 = arith.constant 0 : index
    %c0_78 = arith.constant 0 : index
    %288 = vector.load %arg7[%c0_77, %c0_78] : memref<128x256xbf16, #tpu.memory_space<vmem>>, vector<128x256xbf16>
    %cst_79 = arith.constant dense<0.000000e+00> : vector<2x256xf32>
    %289 = tpu.matmul %287, %288, %cst_79 {dimension_numbers = #tpu.dot_dimension_numbers<[1], [0], [0], [1], [0, 0, 1, 1], [], []>} : vector<2x128xbf16>, vector<128x256xbf16>, vector<2x256xf32> -> vector<2x256xf32>
    %290 = vector.extract_strided_slice %289 {offsets = [0, 0], sizes = [2, 128], strides = [1, 1]} : vector<2x256xf32> to vector<2x128xf32>
    %291 = vector.extract_strided_slice %289 {offsets = [0, 128], sizes = [2, 128], strides = [1, 1]} : vector<2x256xf32> to vector<2x128xf32>
    %cst_80 = arith.constant 5.000000e-01 : f32
    %292 = vector.broadcast %cst_80 : f32 to vector<2x128xf32>
    %293 = arith.mulf %292, %291 : vector<2x128xf32>
    %294 = math.exp %293 : vector<2x128xf32>
    %295 = arith.mulf %284, %294 : vector<2x128xf32>
    %cst_81 = arith.constant 1.000000e+00 : f32
    %296 = vector.broadcast %cst_81 : f32 to vector<2x128xf32>
    %297 = arith.mulf %295, %296 : vector<2x128xf32>
    %298 = arith.addf %290, %297 : vector<2x128xf32>
    %c0_82 = arith.constant 0 : index
    %c0_83 = arith.constant 0 : index
    %299 = vector.load %arg10[%c0_82, %c0_83] : memref<2x128xf32, #tpu.memory_space<vmem>>, vector<2x128xf32>
    tpu.vector_store %arg10[%c0_82, %c0_83], %298 {strides = array<i32>} : memref<2x128xf32, #tpu.memory_space<vmem>>, vector<2x128xf32>,
    return
  }
  func.func @transform_0(%arg0: i32) -> (i32, i32) {
    %c0_i32 = arith.constant 0 : i32
    %c0_i32_0 = arith.constant 0 : i32
    %c0_i32_1 = arith.constant 0 : i32
    return %c0_i32, %c0_i32_0 : i32, i32
  }
  func.func @transform_1(%arg0: i32) -> (i32, i32) {
    %c0_i32 = arith.constant 0 : i32
    %c0_i32_0 = arith.constant 0 : i32
    %c0_i32_1 = arith.constant 0 : i32
    return %c0_i32, %c0_i32_0 : i32, i32
  }
  func.func @transform_2(%arg0: i32) -> (i32, i32) {
    %c0_i32 = arith.constant 0 : i32
    %c0_i32_0 = arith.constant 0 : i32
    %c0_i32_1 = arith.constant 0 : i32
    return %c0_i32, %c0_i32_0 : i32, i32
  }
  func.func @transform_3(%arg0: i32) -> (i32, i32) {
    %c0_i32 = arith.constant 0 : i32
    %c0_i32_0 = arith.constant 0 : i32
    %c0_i32_1 = arith.constant 0 : i32
    return %c0_i32, %c0_i32_0 : i32, i32
  }
  func.func @transform_4(%arg0: i32) -> (i32, i32, i32) {
    %c0_i32 = arith.constant 0 : i32
    %c0_i32_0 = arith.constant 0 : i32
    %c0_i32_1 = arith.constant 0 : i32
    %c0_i32_2 = arith.constant 0 : i32
    return %c0_i32, %c0_i32_0, %c0_i32_1 : i32, i32, i32
  }
  func.func @transform_5(%arg0: i32) -> (i32, i32, i32) {
    %c0_i32 = arith.constant 0 : i32
    %c0_i32_0 = arith.constant 0 : i32
    %c0_i32_1 = arith.constant 0 : i32
    %c0_i32_2 = arith.constant 0 : i32
    return %c0_i32, %c0_i32_0, %c0_i32_1 : i32, i32, i32
  }
  func.func @transform_6(%arg0: i32) -> (i32, i32) {
    %c0_i32 = arith.constant 0 : i32
    %c0_i32_0 = arith.constant 0 : i32
    %c0_i32_1 = arith.constant 0 : i32
    return %c0_i32, %c0_i32_0 : i32, i32
  }
  func.func @transform_7(%arg0: i32) -> (i32, i32) {
    %c0_i32 = arith.constant 0 : i32
    %c0_i32_0 = arith.constant 0 : i32
    %c0_i32_1 = arith.constant 0 : i32
    return %c0_i32, %c0_i32_0 : i32, i32
  }
  func.func @transform_8(%arg0: i32) -> (i32, i32) {
    %c0_i32 = arith.constant 0 : i32
    %c0_i32_0 = arith.constant 0 : i32
    %c0_i32_1 = arith.constant 0 : i32
    return %c0_i32, %c0_i32_0 : i32, i32
  }
  func.func @transform_9(%arg0: i32) -> (i32, i32) {
    %c0_i32 = arith.constant 0 : i32
    %c0_i32_0 = arith.constant 0 : i32
    %c0_i32_1 = arith.constant 0 : i32
    return %c0_i32, %c0_i32_0 : i32, i32
  }
}

</mosaic_0001>

<bundles_post_ra>
// kernel: eq.15
= control target key start
LH: loop header
LB: loop body
LE: loop exit
PB: predicated region body
PF: predicated region fallthrough
CT: control target
= control target key end

     0   :  { %vm7_vm0 = vcmask 64512   ;;  %vm13_vm1 = vcmask 130112   ;;  %s39_s0 = inlined_call_operand.vmem [shape: s32[2,8], index: 0, kind: input, shape index: {}]   ;;  %s40_s1 = inlined_call_operand.vmem [shape: s32[16], index: 1, kind: output, shape index: {}]  }
   0x1   :  { %v4_v0 = vld [vmem:[%s39_s0] sm:$0x3]  ;;  %s22_s0 = smov 8  }
   0x2   :  { %5 = vst [vmem:[#allocation1] sm:$0x3] %v4_v0 }
   0x9   :  { %v10_v1 = vld [vmem:[#allocation1 + $0x1] sm:$0x1]   ;;  %v6_v2 = vld [vmem:[#allocation1] sm:$0x1]  }
   0xa   :  { %11 = vrot.lane.b32.xlu0 %v10_v1, %s22_s0  ;;  %8 = vst.msk [vmem:[#allocation0] sm:$0x1] %vm7_vm0, %v6_v2  }
  0x7c   :  { %v12_v3 = vpop.permute.xlu0 %11  }
  0x7d   :  { %14 = vst.msk [vmem:[#allocation0] sm:$0x1] %vm13_vm1, %v12_v3  }
  0x84   :  { %v17_v4 = vld [vmem:[#allocation0] sm:$0x1] }
  0x85   :  { %20 = vst [vmem:[%s40_s1] sm:$0x1] %v17_v4 }

// kernel: seqvae_jit_forward.1
= control target key start
LH: loop header
LB: loop body
LE: loop exit
PB: predicated region body
PF: predicated region fallthrough
CT: control target
= control target key end

     0   :  { %14 = vsyncpa [#allocation3], 0  ;;  %s3123_s0 = inlined_call_operand.vmem [shape: f32[16,48], index: 0, kind: input, shape index: {}]   ;;  %s3124_s1 = inlined_call_operand.vmem [shape: f32[16,16], index: 1, kind: input, shape index: {}]   ;;  %s3125_s2 = inlined_call_operand.vmem [shape: f32[2,144], index: 2, kind: input, shape index: {}]   ;;  %s3126_s3 = inlined_call_operand.vmem [shape: f32[48,128], index: 3, kind: input, shape index: {}]   ;;  %s3127_s4 = inlined_call_operand.hbm [shape: bf16[2,128,768], index: 4, kind: input, shape index: {}]   ;;  %s3128_s5 = inlined_call_operand.hbm [shape: bf16[2,256,128], index: 5, kind: input, shape index: {}]   ;;  %s3129_s6 = inlined_call_operand.hbm [shape: bf16[128,256], index: 6, kind: input, shape index: {}]   ;;  %s3130_s7 = inlined_call_operand.vmem [shape: f32[12,128], index: 7, kind: input, shape index: {}]   ;;  %s3131_s8 = inlined_call_operand.vmem [shape: f32[2,256], index: 8, kind: input, shape index: {}]   ;;  %s3132_s9 = inlined_call_operand.hbm [shape: f32[2,128], index: 9, kind: output, shape index: {}]  }
   0x1   :  { %15 = vsyncpa [#allocation6], 0  ;;  %s42_s11 = sshll.u32 %s3128_s5, 4  ;;  %s43_s11 = int_to_ptr.hbm [resolvable:$true] %s42_s11 }
   0x2   :  { %16 = vsyncpa [#allocation4], 0  ;;  %s2826_s12 = smov [#allocation5]   ;;  %s29_s16 = sshll.u32 %s3127_s4, 4  ;;  %s30_s16 = int_to_ptr.hbm [resolvable:$true] %s29_s16 }
   0x3   :  { %s44_s13 = sshll.u32 %s2826_s12, 4  ;;  %s2827_s17 = smov 64   ;;  %s45_s13 = int_to_ptr.vmem [resolvable:$true] %s44_s13 }
   0x4   :  { %s2828_s18 = smov 4   ;;  %s2829_s19 = smov [#allocation2]  }
   0x5   :  { %50 = dma.hbm_to_vmem [thread:$0]  %s43_s11, 4096, %s45_s13, [#allocation6], %s2827_s17, %s2827_s17, %s2828_s18  }
   0x6   :  { %s31_s20 = sshll.u32 %s2829_s19, 4  ;;  %s2830_s21 = smov 384   ;;  %s32_s20 = int_to_ptr.vmem [resolvable:$true] %s31_s20 }
   0x7   :  { %s2831_s22 = smov 24   ;;  %s55_s24 = sshll.u32 %s3129_s6, 4  ;;  %s56_s24 = int_to_ptr.hbm [resolvable:$true] %s55_s24 }
   0x8   :  { %37 = dma.hbm_to_vmem [thread:$0]  %s30_s16, 12288, %s32_s20, [#allocation3], %s2830_s21, %s2830_s21, %s2831_s22  }
   0x9   :  { %s2832_s25 = smov [#allocation7]   ;;  %s2833_s27 = smov 128  }
   0xa   :  { %s57_s26 = sshll.u32 %s2832_s25, 4  ;;  %s2834_s4 = smov 8   ;;  %s58_s26 = int_to_ptr.vmem [resolvable:$true] %s57_s26 }
   0xb   :  { %63 = dma.hbm_to_vmem [thread:$0]  %s56_s24, 2048, %s58_s26, [#allocation6], %s2833_s27, %s2833_s27, %s2834_s4  }
   0xc   :  { %2820 = dma.done.wait [#allocation3], 12288  }
   0xd   :  { %2821 = vsyncadd [#allocation3], 4294955008 }
   0xe   :  { %2822 = dma.done.wait [#allocation6], 6144  }
   0xf   :  { %2823 = vsyncadd [#allocation6], 4294961152  ;;  %v105_v0 = vld [vmem:[%s3126_s3 + $0x28] sm:$0xff]  ;;  %v104_v1 = vld [vmem:[%s3126_s3 + $0x20] sm:$0xff]  ;;  %vm106_vm0 = vcmask 392192   ;;  %vm424_vm9 = vcmask 130048  }
  0x10   :  { %123 = vmatpush.msra.mxu0 %v105_v0  ;;  %v103_v2 = vld [vmem:[%s3126_s3 + $0x18] sm:$0xff]  ;;  %v102_v3 = vld [vmem:[%s3126_s3 + $0x10] sm:$0xff]  ;;  %v101_v4 = vld [vmem:[%s3126_s3 + $0x8] sm:$0xff]  ;;  %s1918_s6 = sshll.u32 %s3132_s9, 4  ;;  %s1919_s6 = int_to_ptr.hbm [resolvable:$true] %s1918_s6 }
  0x11   :  { %v100_v5 = vld [vmem:[%s3126_s3] sm:$0xff]  ;;  %v99_v7 = vld [vmem:[%s3123_s0 + $0x8] sm:$0xff]  ;;  %v2019_v12 = vld [vmem:[#allocation2 + $0x150] sm:$0xf] }
  0x12   :  { %124 = vmatpush.msra.mxu0 %v104_v1  ;;  %v98_v6 = vld [vmem:[%s3123_s0] sm:$0xff]  ;;  %v2559_v13 = vld [vmem:[#allocation2 + $0x164] sm:$0xf0]  ;;  %v2556_v14 = vld [vmem:[#allocation2 + $0x154] sm:$0xf] }
  0x13   :  { %v2020_v15 = vor.u32 %v2559_v13, %v2019_v12  ;;  %v2021_v16 = vld [vmem:[#allocation2 + $0x168] sm:$0xf0]  ;;  %v2027_v17 = vld [vmem:[#allocation2 + $0x158] sm:$0xf]  ;;  %v2560_v18 = vld [vmem:[#allocation2 + $0x16c] sm:$0xf0] }
  0x14   :  { %125 = vmatpush.msra.mxu0 %v103_v2  ;;  %v2024_v19 = vor.u32 %v2556_v14, %v2021_v16  ;;  %v2028_v20 = vor.u32 %v2560_v18, %v2027_v17  ;;  %v2007_v21 = vld [vmem:[#allocation2 + $0x120] sm:$0xf]  ;;  %v2553_v22 = vld [vmem:[#allocation2 + $0x134] sm:$0xf0]  ;;  %v2550_v23 = vld [vmem:[#allocation2 + $0x124] sm:$0xf] }
  0x15   :  { %363 = vmatpush.bf16.msra.mxu1 %v2020_v15  ;;  %v2008_v24 = vor.u32 %v2553_v22, %v2007_v21  ;;  %v2009_v25 = vld [vmem:[#allocation2 + $0x138] sm:$0xf0]  ;;  %v2015_v26 = vld [vmem:[#allocation2 + $0x128] sm:$0xf]  ;;  %v2554_v27 = vld [vmem:[#allocation2 + $0x13c] sm:$0xf0] }
  0x16   :  { %126 = vmatpush.msra.mxu0 %v102_v3  ;;  %377 = vmatpush.bf16.msra.mxu2 %v2024_v19  ;;  %v2012_v28 = vor.u32 %v2550_v23, %v2009_v25  ;;  %v2016_v29 = vor.u32 %v2554_v27, %v2015_v26  ;;  %v1995_v30 = vld [vmem:[#allocation2 + $0xf0] sm:$0xf]  ;;  %v2547_v31 = vld [vmem:[#allocation2 + $0x104] sm:$0xf0]  ;;  %v2544_v32 = vld [vmem:[#allocation2 + $0xf4] sm:$0xf] }
  0x17   :  { %391 = vmatpush.bf16.msra.mxu3 %v2028_v20  ;;  %v1996_v33 = vor.u32 %v2547_v31, %v1995_v30  ;;  %v1997_v34 = vld [vmem:[#allocation2 + $0x108] sm:$0xf0]  ;;  %v2003_v35 = vld [vmem:[#allocation2 + $0xf8] sm:$0xf]  ;;  %v2548_v36 = vld [vmem:[#allocation2 + $0x10c] sm:$0xf0] }
  0x18   :  { %127 = vmatpush.msra.mxu0 %v101_v4  ;;  %v2000_v37 = vor.u32 %v2544_v32, %v1997_v34  ;;  %v2004_v38 = vor.u32 %v2548_v36, %v2003_v35  ;;  %v1983_v39 = vld [vmem:[#allocation2 + $0xc0] sm:$0xf]  ;;  %v2541_v40 = vld [vmem:[#allocation2 + $0xd4] sm:$0xf0]  ;;  %v2538_v41 = vld [vmem:[#allocation2 + $0xc4] sm:$0xf] }
  0x19   :  { %364 = vmatpush.bf16.msra.mxu1 %v2008_v24  ;;  %v1984_v42 = vor.u32 %v2541_v40, %v1983_v39  ;;  %v1985_v43 = vld [vmem:[#allocation2 + $0xd8] sm:$0xf0]  ;;  %v1991_v44 = vld [vmem:[#allocation2 + $0xc8] sm:$0xf]  ;;  %v2542_v45 = vld [vmem:[#allocation2 + $0xdc] sm:$0xf0] }
  0x1a   :  { %128 = vmatpush.msra.mxu0 %v100_v5  ;;  %378 = vmatpush.bf16.msra.mxu2 %v2012_v28  ;;  %v1988_v46 = vor.u32 %v2538_v41, %v1985_v43  ;;  %v1992_v47 = vor.u32 %v2542_v45, %v1991_v44  ;;  %v1971_v48 = vld [vmem:[#allocation2 + $0x90] sm:$0xf]  ;;  %v2535_v49 = vld [vmem:[#allocation2 + $0xa4] sm:$0xf0]  ;;  %v2532_v50 = vld [vmem:[#allocation2 + $0x94] sm:$0xf] }
  0x1b   :  { %1931 = vmatmul.msk.f32.vlgmr.msra.gmra.mxu0 %vm106_vm0, %v98_v6  ;;  %392 = vmatpush.bf16.msra.mxu3 %v2016_v29  ;;  %v1972_v51 = vor.u32 %v2535_v49, %v1971_v48  ;;  %v1973_v52 = vld [vmem:[#allocation2 + $0xa8] sm:$0xf0]  ;;  %v1979_v53 = vld [vmem:[#allocation2 + $0x98] sm:$0xf]  ;;  %v2536_v54 = vld [vmem:[#allocation2 + $0xac] sm:$0xf0] }
  0x1c   :  { %v1976_v55 = vor.u32 %v2532_v50, %v1973_v52  ;;  %v1980_v56 = vor.u32 %v2536_v54, %v1979_v53  ;;  %v1959_v57 = vld [vmem:[#allocation2 + $0x60] sm:$0xf]  ;;  %v2529_v58 = vld [vmem:[#allocation2 + $0x74] sm:$0xf0]  ;;  %v2526_v59 = vld [vmem:[#allocation2 + $0x64] sm:$0xf] }
  0x1d   :  { %365 = vmatpush.bf16.msra.mxu1 %v1996_v33  ;;  %v1960_v60 = vor.u32 %v2529_v58, %v1959_v57  ;;  %v1961_v61 = vld [vmem:[#allocation2 + $0x78] sm:$0xf0]  ;;  %v1967_v62 = vld [vmem:[#allocation2 + $0x68] sm:$0xf]  ;;  %v2530_v63 = vld [vmem:[#allocation2 + $0x7c] sm:$0xf0] }
  0x1e   :  { %379 = vmatpush.bf16.msra.mxu2 %v2000_v37  ;;  %v1964_v0 = vor.u32 %v2526_v59, %v1961_v61  ;;  %v1968_v1 = vor.u32 %v2530_v63, %v1967_v62  ;;  %v1947_v4 = vld [vmem:[#allocation2 + $0x30] sm:$0xf]  ;;  %v2523_v5 = vld [vmem:[#allocation2 + $0x44] sm:$0xf0]  ;;  %v1955_v12 = vld [vmem:[#allocation2 + $0x38] sm:$0xf]  ;;  %v86_v62 = vlaneseq }
  0x1f   :  { %393 = vmatpush.bf16.msra.mxu3 %v2004_v38  ;;  %v2524_v16 = vld [vmem:[#allocation2 + $0x4c] sm:$0xf0]  ;;  %v1935_v17 = vld [vmem:[#allocation2] sm:$0xf]  ;;  %v2517_v19 = vld [vmem:[#allocation2 + $0x14] sm:$0xf0] }
  0x20   :  { %v1956_v18 = vor.u32 %v2524_v16, %v1955_v12  ;;  %v2514_v20 = vld [vmem:[#allocation2 + $0x4] sm:$0xf]  ;;  %v1937_v21 = vld [vmem:[#allocation2 + $0x18] sm:$0xf0]  ;;  %v1936_v23 = vor.u32 %v2517_v19, %v1935_v17  ;;  %v1943_v25 = vld [vmem:[#allocation2 + $0x8] sm:$0xf] }
  0x21   :  { %366 = vmatpush.bf16.msra.mxu1 %v1984_v42  ;;  %v1940_v24 = vor.u32 %v2514_v20, %v1937_v21  ;;  %v2518_v26 = vld [vmem:[#allocation2 + $0x1c] sm:$0xf0]  ;;  %v2956_v17 = vld [vmem:[%s3124_s1] sm:$0xff] }
  0x22   :  { %380 = vmatpush.bf16.msra.mxu2 %v1988_v46  ;;  %v1944_v27 = vor.u32 %v2518_v26, %v1943_v25 }
  0x23   :  { %1932 = vmatmul.msk.f32.gmra.mxu0 %vm106_vm0, %v99_v7  ;;  %394 = vmatpush.bf16.msra.mxu3 %v1992_v47  ;;  %v1948_v7 = vor.u32 %v2523_v5, %v1947_v4  ;;  %v2933_v47 = vld [vmem:[%s3130_s7] sm:$0xff] }
  0x24   :  { %v183_v57 = vperm.slane %v2933_v47, 1 }
  0x25   :  { %367 = vmatpush.bf16.msra.mxu1 %v1972_v51  ;;  %v180_v51 = vperm.slane %v2933_v47, 0 }
  0x26   :  { %381 = vmatpush.bf16.msra.mxu2 %v1976_v55 }
  0x27   :  { %395 = vmatpush.bf16.msra.mxu3 %v1980_v56 }
  0x29   :  { %368 = vmatpush.bf16.msra.mxu1 %v1960_v60 }
  0x2a   :  { %382 = vmatpush.bf16.msra.mxu2 %v1964_v0  ;;  %v87_v0 = vand.u32 127, %v86_v62  ;;  %v2539_v62 = vld [vmem:[#allocation2 + $0xcc] sm:$0xf] }
  0x2b   :  { %396 = vmatpush.bf16.msra.mxu3 %v1968_v1 }
  0x2c   :  { %vm89_vm7 = vcmp.lt.s32.totalorder %v87_v0, 64  ;;  %vm93_vm8 = vcmp.ge.s32.totalorder %v87_v0, 64 }
  0x2d   :  { %369 = vmatpush.bf16.msra.mxu1 %v1948_v7 }
  0x2f   :  { %397 = vmatpush.bf16.msra.mxu3 %v1956_v18 }
  0x31   :  { %370 = vmatpush.bf16.msra.mxu1 %v1936_v23 }
  0x33   :  { %398 = vmatpush.bf16.msra.mxu3 %v1944_v27 }
  0x98   :  { %v2920_v8 = vpop.f32.mrf.mxu0 }
  0x99   :  { %136 = vadd.xlane.f32.xlu0 %v2920_v8  ;;  %v140_v9 = vmul.f32 %v2920_v8, %v2920_v8 }
  0x9b   :  { %142 = vadd.xlane.f32.xlu1 %v140_v9  ;;  %v2520_v9 = vld [vmem:[#allocation2 + $0x34] sm:$0xf] }
  0xa0   :  { %v2925_v10 = vpop.f32.mrf.mxu0 }
  0xa1   :  { %138 = vadd.xlane.f32.xlu0 %v2925_v10  ;;  %v141_v11 = vmul.f32 %v2925_v10, %v2925_v10 }
  0xa3   :  { %144 = vadd.xlane.f32.xlu1 %v141_v11  ;;  %v1949_v11 = vld [vmem:[#allocation2 + $0x48] sm:$0xf0] }
  0xa4   :  { %v1952_v15 = vor.u32 %v2520_v9, %v1949_v11 }
  0xa6   :  { %383 = vmatpush.bf16.msra.mxu2 %v1952_v15 }
  0xaa   :  { %384 = vmatpush.bf16.msra.mxu2 %v1940_v24  ;;  %v2965_v24 = vld [vmem:[%s3124_s1 + $0x8] sm:$0xff] }
 0x10c   :  { %v137_v2 = vpop.xlane.xlu0 %136 }
 0x10d   :  { %v146_v3 = vmul.f32 0.0078125, %v137_v2 }
 0x10e   :  { %v143_v6 = vpop.xlane.xlu1 %142 }
 0x10f   :  { %v150_v13 = vmul.f32 %v146_v3, %v146_v3  ;;  %v148_v14 = vmul.f32 0.0078125, %v143_v6  ;;  %v154_v48 = vsub.f32 %v2920_v8, %v146_v3  ;;  %v2835_v6 = vmov 0.0  }
 0x110   :  { %v2945_v7 = vsel %vm89_vm7, 1.0, %v2835_v6  ;;  %v2947_v9 = vsel %vm93_vm8, 1.0, %v2835_v6 }
 0x111   :  { %v152_v22 = vsub.f32 %v148_v14, %v150_v13 }
 0x113   :  { %v156_v28 = vadd.f32 1e-06, %v152_v22 }
 0x114   :  { %v139_v29 = vpop.xlane.xlu0 %138 }
 0x115   :  { %2669 = vrsqrt.f32 %v156_v28  ;;  %v147_v30 = vmul.f32 0.0078125, %v139_v29  ;;  %vm164_vm2 = vweird.f32 %v156_v28 }
 0x116   :  { %v145_v31 = vpop.xlane.xlu1 %144 }
 0x117   :  { %v151_v32 = vmul.f32 %v147_v30, %v147_v30  ;;  %v149_v33 = vmul.f32 0.0078125, %v145_v31  ;;  %v155_v53 = vsub.f32 %v2925_v10, %v147_v30 }
 0x119   :  { %v153_v34 = vsub.f32 %v149_v33, %v151_v32 }
 0x11b   :  { %v2670_v35 = vpop.eup %2669  ;;  %v157_v36 = vadd.f32 1e-06, %v153_v34 }
 0x11c   :  { %v159_v37 = vmul.f32 %v2670_v35, %v156_v28  ;;  %vm165_vm1 = vweird.f32 %v2670_v35 }
 0x11d   :  { %2671 = vrsqrt.f32 %v157_v36  ;;  %vm166_vm3 = vmor %vm164_vm2, %vm165_vm1  ;;  %vm174_vm5 = vweird.f32 %v157_v36 }
 0x11e   :  { %v160_v38 = vmul.f32 %v2670_v35, %v159_v37 }
 0x120   :  { %v161_v39 = vmul.f32 0.5, %v160_v38 }
 0x122   :  { %v162_v40 = vsub.f32 1.5, %v161_v39 }
 0x123   :  { %v2672_v41 = vpop.eup %2671 }
 0x124   :  { %v163_v42 = vmul.f32 %v2670_v35, %v162_v40  ;;  %v169_v43 = vmul.f32 %v2672_v41, %v157_v36  ;;  %vm175_vm4 = vweird.f32 %v2672_v41 }
 0x125   :  { %vm176_vm6 = vmor %vm174_vm5, %vm175_vm4 }
 0x126   :  { %v170_v44 = vmul.f32 %v2672_v41, %v169_v43  ;;  %v167_v45 = vsel %vm166_vm3, %v2670_v35, %v163_v42 }
 0x127   :  { %v178_v50 = vmul.f32 %v167_v45, %v154_v48 }
 0x128   :  { %v171_v46 = vmul.f32 0.5, %v170_v44 }
 0x129   :  { %v181_v56 = vmul.f32 %v180_v51, %v178_v50 }
 0x12a   :  { %v172_v49 = vsub.f32 1.5, %v171_v46 }
 0x12b   :  { %v2939_v59 = vadd.f32 %v183_v57, %v181_v56  ;;  %v2055_v56 = vld [vmem:[#allocation2 + $0x140] sm:$0xf0] }
 0x12c   :  { %v173_v52 = vmul.f32 %v2672_v41, %v172_v49 }
 0x12e   :  { %v177_v54 = vsel %vm176_vm6, %v2672_v41, %v173_v52  ;;  %v2557_v52 = vld [vmem:[#allocation2 + $0x15c] sm:$0xf] }
 0x12f   :  { %v179_v55 = vmul.f32 %v177_v54, %v155_v53  ;;  %v2059_v53 = vld [vmem:[#allocation2 + $0x170] sm:$0xf0]  ;;  %v2551_v54 = vld [vmem:[#allocation2 + $0x12c] sm:$0xf] }
 0x131   :  { %v182_v58 = vmul.f32 %v180_v51, %v179_v55  ;;  %v2062_v55 = vor.u32 %v2557_v52, %v2059_v53  ;;  %v2561_v53 = vld [vmem:[#allocation2 + $0x174] sm:$0xf0] }
 0x133   :  { %v2941_v60 = vadd.f32 %v183_v57, %v182_v58  ;;  %v2058_v57 = vor.u32 %v2551_v54, %v2055_v56  ;;  %560 = vmatpush.bf16.msrb.mxu3 %v2062_v55  ;;  %v2545_v58 = vld [vmem:[#allocation2 + $0xfc] sm:$0xf]  ;;  %v2558_v54 = vld [vmem:[#allocation2 + $0x164] sm:$0xf] }
 0x134   :  { %v2123_v56 = vld [vmem:[#allocation2 + $0x178] sm:$0xf0] }
 0x135   :  { %v234_v8 = vpack.c.bf16 %v2941_v60, %v2939_v59 }
 0x137   :  { %371 = vmatmul.bf16.vlgmr.msra.gmra.mxu1 %v234_v8  ;;  %385 = vmatmul.bf16.vlgmr.msra.gmra.mxu2 %v234_v8 }
 0x138   :  { %399 = vmatmul.bf16.vlgmr.msra.gmra.mxu3 %v234_v8  ;;  %v2051_v8 = vld [vmem:[#allocation2 + $0x110] sm:$0xf0] }
 0x139   :  { %561 = vmatpush.bf16.msrb.mxu3 %v2058_v57 }
 0x1b4   :  { %v372_v61 = vpop.f32.mrf.mxu1 }
 0x1b5   :  { %v407_v13 = vmul.f32 %v2945_v7, %v372_v61  ;;  %v468_v14 = vmul.f32 %v2947_v9, %v372_v61  ;;  %v2054_v61 = vor.u32 %v2545_v58, %v2051_v8  ;;  %v2113_v58 = vld [vmem:[#allocation2 + $0x130] sm:$0xf]  ;;  %v2555_v8 = vld [vmem:[#allocation2 + $0x144] sm:$0xf0] }
 0x1b7   :  { %562 = vmatpush.bf16.msrb.mxu3 %v2054_v61 }
 0x1ba   :  { %v386_v10 = vpop.f32.mrf.mxu2 }
 0x1bb   :  { %v400_v63 = vpop.f32.mrf.mxu3 }
 0x1bc   :  { %v374_v2 = vpop.f32.mrf.mxu1 }
 0x1bd   :  { %v408_v11 = vmul.f32 %v2945_v7, %v374_v2  ;;  %v469_v12 = vmul.f32 %v2947_v9, %v374_v2  ;;  %v2043_v2 = vld [vmem:[#allocation2 + $0xb0] sm:$0xf0] }
 0x1bf   :  { %v409_v15 = vpack.c.bf16 %v408_v11, %v407_v13  ;;  %v470_v16 = vpack.c.bf16 %v469_v12, %v468_v14 }
 0x1c2   :  { %v388_v1 = vpop.f32.mrf.mxu2 }
 0x1c3   :  { %v405_v3 = vpack.c.bf16 %v388_v1, %v386_v10  ;;  %v402_v4 = vpop.f32.mrf.mxu3  ;;  %v2047_v10 = vld [vmem:[#allocation2 + $0xe0] sm:$0xf0]  ;;  %v2533_v1 = vld [vmem:[#allocation2 + $0x9c] sm:$0xf] }
 0x1c4   :  { %v406_v5 = vpack.c.bf16 %v402_v4, %v400_v63  ;;  %v2050_v0 = vor.u32 %v2539_v62, %v2047_v10  ;;  %v2114_v62 = vor.u32 %v2555_v8, %v2113_v58  ;;  %v2568_v58 = vld [vmem:[#allocation5 + $0x30] sm:$0xff] }
 0x1c5   :  { %417 = vmatpush.bf16.xpose.msrb.mxu0 %v405_v3  ;;  %478 = vmatpush.bf16.xpose.msrb.mxu1 %v405_v3  ;;  %v2046_v3 = vor.u32 %v2533_v1, %v2043_v2  ;;  %v2546_v1 = vld [vmem:[#allocation2 + $0x104] sm:$0xf]  ;;  %v2576_v8 = vld [vmem:[#allocation5 + $0x70] sm:$0xff] }
 0x1c6   :  { %518 = vmatpush.bf16.msrb.mxu2 %v406_v5  ;;  %563 = vmatpush.bf16.msrb.mxu3 %v2050_v0 }
 0x1ca   :  { %564 = vmatpush.bf16.msrb.mxu3 %v2046_v3 }
 0x1cc   :  { %418 = vmatmul.bf16.vlgmr.msrb.gmra.mxu0 %v409_v15  ;;  %479 = vmatmul.bf16.vlgmr.msrb.gmra.mxu1 %v470_v16 }
 0x1cd   :  { %458 = vmatpush.bf16.msra.mxu0 %v406_v5 }
 0x1d1   :  { %574 = vmatpush.bf16.msrb.mxu0 %v2062_v55 }
 0x1d5   :  { %575 = vmatpush.bf16.msrb.mxu0 %v2058_v57  ;;  %v2126_v57 = vor.u32 %v2558_v54, %v2123_v56  ;;  %v2577_v56 = vld [vmem:[#allocation5 + $0x78] sm:$0xff] }
 0x1d7   :  { %742 = vmatpush.bf16.msra.mxu2 %v2126_v57 }
 0x1d9   :  { %576 = vmatpush.bf16.msrb.mxu0 %v2054_v61  ;;  %v2552_v61 = vld [vmem:[#allocation2 + $0x134] sm:$0xf] }
 0x1dd   :  { %577 = vmatpush.bf16.msrb.mxu0 %v2050_v0  ;;  %v2549_v0 = vld [vmem:[#allocation2 + $0x114] sm:$0xf0] }
 0x1e1   :  { %578 = vmatpush.bf16.msrb.mxu0 %v2046_v3  ;;  %v2107_v3 = vld [vmem:[#allocation2 + $0x118] sm:$0xf0] }
 0x249   :  { %v419_v18 = vpop.f32.mrf.mxu0  ;;  %v480_v19 = vpop.f32.mrf.mxu1 }
 0x24a   :  { %v420_v20 = vadd.f32 %v419_v18, %v2956_v17  ;;  %v481_v21 = vadd.f32 %v480_v19, %v2956_v17 }
 0x24c   :  { %v485_v22 = vsel %vm424_vm9, %v481_v21, -inf  ;;  %v425_v23 = vsel %vm424_vm9, %v420_v20, -inf }
 0x24d   :  { %486 = vmax.xlane.f32.xlu2 %v485_v22  ;;  %426 = vmax.xlane.f32.xlu0 %v425_v23  ;;  %v2527_v22 = vld [vmem:[#allocation2 + $0x6c] sm:$0xf]  ;;  %v2039_v23 = vld [vmem:[#allocation2 + $0x80] sm:$0xf0] }
 0x251   :  { %v421_v25 = vpop.f32.mrf.mxu0  ;;  %v482_v26 = vpop.f32.mrf.mxu1 }
 0x252   :  { %v422_v27 = vadd.f32 %v421_v25, %v2965_v24  ;;  %v483_v28 = vadd.f32 %v482_v26, %v2965_v24  ;;  %v2042_v25 = vor.u32 %v2527_v22, %v2039_v23  ;;  %v2521_v26 = vld [vmem:[#allocation2 + $0x3c] sm:$0xf]  ;;  %v2081_v22 = vld [vmem:[#allocation2 + $0x70] sm:$0xf]  ;;  %v2531_v23 = vld [vmem:[#allocation2 + $0x84] sm:$0xf0] }
 0x254   :  { %v488_v29 = vsel %vm424_vm9, %v483_v28, -inf  ;;  %v428_v30 = vsel %vm424_vm9, %v422_v27, -inf  ;;  %579 = vmatpush.bf16.msrb.mxu0 %v2042_v25  ;;  %565 = vmatpush.bf16.msrb.mxu3 %v2042_v25  ;;  %v2528_v25 = vld [vmem:[#allocation2 + $0x74] sm:$0xf] }
 0x255   :  { %489 = vmax.xlane.f32.xlu2 %v488_v29  ;;  %429 = vmax.xlane.f32.xlu1 %v428_v30  ;;  %v2515_v29 = vld [vmem:[#allocation2 + $0xc] sm:$0xf]  ;;  %v2031_v30 = vld [vmem:[#allocation2 + $0x20] sm:$0xf0] }
 0x2c0   :  { %v487_v31 = vpop.xlane.xlu2 %486  ;;  %v427_v32 = vpop.xlane.xlu0 %426 }
 0x2c1   :  { %v491_v33 = vsub.f32 %v481_v21, %v487_v31  ;;  %v431_v34 = vsub.f32 %v420_v20, %v427_v32  ;;  %v2034_v31 = vor.u32 %v2515_v29, %v2031_v30 }
 0x2c3   :  { %v493_v35 = vmul.f32 1.442695, %v491_v33  ;;  %v433_v36 = vmul.f32 1.442695, %v431_v34 }
 0x2c5   :  { %2673 = vpow2.f32 %v493_v35 }
 0x2c6   :  { %2675 = vpow2.f32 %v433_v36 }
 0x2c8   :  { %v490_v37 = vpop.xlane.xlu2 %489  ;;  %v430_v38 = vpop.xlane.xlu1 %429 }
 0x2c9   :  { %v492_v39 = vsub.f32 %v483_v28, %v490_v37  ;;  %v432_v40 = vsub.f32 %v422_v27, %v430_v38  ;;  %v2035_v27 = vld [vmem:[#allocation2 + $0x50] sm:$0xf0] }
 0x2ca   :  { %v2038_v28 = vor.u32 %v2521_v26, %v2035_v27  ;;  %v2082_v26 = vor.u32 %v2531_v23, %v2081_v22  ;;  %v2083_v27 = vld [vmem:[#allocation2 + $0x88] sm:$0xf0] }
 0x2cb   :  { %v2674_v41 = vpop.eup %2673  ;;  %v495_v42 = vmul.f32 1.442695, %v492_v39  ;;  %v435_v43 = vmul.f32 1.442695, %v432_v40  ;;  %v2086_v29 = vor.u32 %v2528_v25, %v2083_v27  ;;  %v637_v25 = vperm.slane %v2933_v47, 3 }
 0x2cc   :  { %v2676_v44 = vpop.eup %2675  ;;  %v497_v45 = vsel %vm424_vm9, %v2674_v41, 0.0  ;;  %580 = vmatpush.bf16.msrb.mxu0 %v2038_v28  ;;  %566 = vmatpush.bf16.msrb.mxu3 %v2038_v28 }
 0x2cd   :  { %2677 = vpow2.f32 %v495_v42  ;;  %498 = vadd.xlane.f32.xlu2 %v497_v45  ;;  %v437_v46 = vsel %vm424_vm9, %v2676_v44, 0.0 }
 0x2ce   :  { %2679 = vpow2.f32 %v435_v43  ;;  %438 = vadd.xlane.f32.xlu1 %v437_v46 }
 0x2d0   :  { %581 = vmatpush.bf16.msrb.mxu0 %v2034_v31  ;;  %567 = vmatpush.bf16.msrb.mxu3 %v2034_v31 }
 0x2d3   :  { %v2678_v48 = vpop.eup %2677 }
 0x2d4   :  { %v2680_v49 = vpop.eup %2679  ;;  %v500_v50 = vsel %vm424_vm9, %v2678_v48, 0.0 }
 0x2d5   :  { %v440_v51 = vsel %vm424_vm9, %v2680_v49, 0.0  ;;  %501 = vadd.xlane.f32.xlu0 %v500_v50 }
 0x2d6   :  { %441 = vadd.xlane.f32.xlu2 %v440_v51 }
 0x340   :  { %v499_v63 = vpop.xlane.xlu2 %498 }
 0x341   :  { %v439_v4 = vpop.xlane.xlu1 %438  ;;  %2681 = vrcp.f32 %v499_v63  ;;  %v2105_v63 = vld [vmem:[#allocation2 + $0x100] sm:$0xf] }
 0x342   :  { %2683 = vrcp.f32 %v439_v4  ;;  %v2106_v2 = vor.u32 %v2549_v0, %v2105_v63  ;;  %v2110_v4 = vor.u32 %v2546_v1, %v2107_v3  ;;  %v2575_v63 = vld [vmem:[#allocation5 + $0x68] sm:$0xff] }
 0x347   :  { %v2682_v11 = vpop.eup %2681 }
 0x348   :  { %v502_v5 = vpop.xlane.xlu0 %501  ;;  %v2684_v12 = vpop.eup %2683  ;;  %v505_v15 = vmul.f32 %v2682_v11, %v2674_v41  ;;  %v2540_v11 = vld [vmem:[#allocation2 + $0xd4] sm:$0xf] }
 0x349   :  { %v442_v6 = vpop.xlane.xlu2 %441  ;;  %2685 = vrcp.f32 %v502_v5  ;;  %v445_v18 = vmul.f32 %v2684_v12, %v2676_v44  ;;  %v2097_v5 = vld [vmem:[#allocation2 + $0xd0] sm:$0xf] }
 0x34a   :  { %2687 = vrcp.f32 %v442_v6  ;;  %v2543_v6 = vld [vmem:[#allocation2 + $0xe4] sm:$0xf0] }
 0x34b   :  { %v2098_v12 = vor.u32 %v2543_v6, %v2097_v5 }
 0x34f   :  { %v2686_v13 = vpop.eup %2685 }
 0x350   :  { %v2688_v14 = vpop.eup %2687  ;;  %v506_v16 = vmul.f32 %v2686_v13, %v2678_v48  ;;  %v2099_v13 = vld [vmem:[#allocation2 + $0xe8] sm:$0xf0] }
 0x351   :  { %v446_v19 = vmul.f32 %v2688_v14, %v2680_v49  ;;  %v2102_v14 = vor.u32 %v2540_v11, %v2099_v13 }
 0x352   :  { %v507_v20 = vpack.c.bf16 %v506_v16, %v505_v15  ;;  %v2089_v15 = vld [vmem:[#allocation2 + $0xa0] sm:$0xf]  ;;  %v2537_v16 = vld [vmem:[#allocation2 + $0xb4] sm:$0xf0] }
 0x353   :  { %v447_v21 = vpack.c.bf16 %v446_v19, %v445_v18  ;;  %v2534_v18 = vld [vmem:[#allocation2 + $0xa4] sm:$0xf]  ;;  %v2090_v19 = vor.u32 %v2537_v16, %v2089_v15 }
 0x354   :  { %2030 = vmatmul.msk.bf16.vlgmr.msrb.gmra.mxu2 %vm424_vm9, %v507_v20  ;;  %v2091_v20 = vld [vmem:[#allocation2 + $0xb8] sm:$0xf0] }
 0x355   :  { %2029 = vmatmul.msk.bf16.vlgmr.msra.gmra.mxu0 %vm424_vm9, %v447_v21  ;;  %v2094_v21 = vor.u32 %v2534_v18, %v2091_v20  ;;  %v634_v18 = vperm.slane %v2933_v47, 2 }
 0x356   :  { %905 = vmatpush.bf16.msra.mxu0 %v2577_v56 }
 0x35a   :  { %906 = vmatpush.bf16.msra.mxu0 %v2576_v8 }
 0x35e   :  { %907 = vmatpush.bf16.msra.mxu0 %v2575_v63 }
 0x3d2   :  { %v460_v32 = vpop.f32.mrf.mxu0 }
 0x3d3   :  { %v465_v35 = vmul.f32 %v2945_v7, %v460_v32  ;;  %v2073_v32 = vld [vmem:[#allocation2 + $0x40] sm:$0xf] }
 0x3d7   :  { %v520_v33 = vpop.f32.mrf.mxu2 }
 0x3d8   :  { %v525_v39 = vmul.f32 %v2947_v9, %v520_v33  ;;  %v2525_v33 = vld [vmem:[#allocation2 + $0x54] sm:$0xf0] }
 0x3da   :  { %v462_v34 = vpop.f32.mrf.mxu0 }
 0x3db   :  { %v466_v36 = vmul.f32 %v2945_v7, %v462_v34  ;;  %v2522_v34 = vld [vmem:[#allocation2 + $0x44] sm:$0xf] }
 0x3dd   :  { %v467_v37 = vpack.c.bf16 %v466_v36, %v465_v35 }
 0x3df   :  { %582 = vmatmul.bf16.vlgmr.msrb.gmra.mxu0 %v467_v37  ;;  %v522_v38 = vpop.f32.mrf.mxu2  ;;  %v2074_v37 = vor.u32 %v2525_v33, %v2073_v32  ;;  %v2573_v32 = vld [vmem:[#allocation5 + $0x58] sm:$0xff]  ;;  %v2572_v33 = vld [vmem:[#allocation5 + $0x50] sm:$0xff] }
 0x3e0   :  { %v526_v40 = vmul.f32 %v2947_v9, %v522_v38  ;;  %v2075_v38 = vld [vmem:[#allocation2 + $0x58] sm:$0xf0] }
 0x3e2   :  { %v527_v41 = vpack.c.bf16 %v526_v40, %v525_v39  ;;  %v2065_v39 = vld [vmem:[#allocation2 + $0x10] sm:$0xf]  ;;  %v2078_v40 = vor.u32 %v2522_v34, %v2075_v38  ;;  %v2562_v34 = vld [vmem:[#allocation5] sm:$0xff] }
 0x3e4   :  { %568 = vmatmul.bf16.vlgmr.msrb.gmra.mxu3 %v527_v41  ;;  %v2519_v41 = vld [vmem:[#allocation2 + $0x24] sm:$0xf0] }
 0x45c   :  { %v583_v42 = vpop.f32.mrf.mxu0 }
 0x464   :  { %v585_v48 = vpop.f32.mrf.mxu0 }
 0x467   :  { %v569_v43 = vpop.f32.mrf.mxu3 }
 0x468   :  { %v584_v44 = vadd.f32 %v583_v42, %v569_v43  ;;  %v2516_v42 = vld [vmem:[#allocation2 + $0x14] sm:$0xf]  ;;  %v2067_v43 = vld [vmem:[#allocation2 + $0x28] sm:$0xf0] }
 0x46a   :  { %v2982_v45 = vadd.f32 %v584_v44, %v2939_v59  ;;  %v2121_v59 = vld [vmem:[#allocation2 + $0x160] sm:$0xf] }
 0x46b   :  { %v2122_v55 = vor.u32 %v2561_v53, %v2121_v59 }
 0x46c   :  { %590 = vadd.xlane.f32.xlu0 %v2982_v45  ;;  %v594_v46 = vmul.f32 %v2982_v45, %v2982_v45 }
 0x46d   :  { %728 = vmatpush.bf16.msra.mxu1 %v2122_v55  ;;  %v2569_v55 = vld [vmem:[#allocation5 + $0x38] sm:$0xff] }
 0x46e   :  { %596 = vadd.xlane.f32.xlu2 %v594_v46  ;;  %v2066_v46 = vor.u32 %v2519_v41, %v2065_v39  ;;  %891 = vmatpush.bf16.msra.mxu3 %v2569_v55 }
 0x46f   :  { %v571_v49 = vpop.f32.mrf.mxu3 }
 0x470   :  { %v586_v50 = vadd.f32 %v585_v48, %v571_v49  ;;  %v2070_v48 = vor.u32 %v2516_v42, %v2067_v43 }
 0x471   :  { %729 = vmatpush.bf16.msra.mxu1 %v2114_v62 }
 0x472   :  { %v2988_v51 = vadd.f32 %v586_v50, %v2941_v60  ;;  %v2115_v60 = vld [vmem:[#allocation2 + $0x148] sm:$0xf0]  ;;  %892 = vmatpush.bf16.msra.mxu3 %v2568_v58  ;;  %v794_v58 = vperm.slane %v2933_v47, 6 }
 0x473   :  { %v2118_v10 = vor.u32 %v2552_v61, %v2115_v60 }
 0x474   :  { %592 = vadd.xlane.f32.xlu1 %v2988_v51  ;;  %v595_v52 = vmul.f32 %v2988_v51, %v2988_v51 }
 0x475   :  { %743 = vmatpush.bf16.msra.mxu2 %v2118_v10  ;;  %730 = vmatpush.bf16.msra.mxu1 %v2106_v2  ;;  %v2567_v10 = vld [vmem:[#allocation5 + $0x28] sm:$0xff]  ;;  %v2566_v2 = vld [vmem:[#allocation5 + $0x20] sm:$0xff] }
 0x476   :  { %598 = vadd.xlane.f32.xlu0 %v595_v52  ;;  %893 = vmatpush.bf16.msra.mxu3 %v2567_v10 }
 0x479   :  { %744 = vmatpush.bf16.msra.mxu2 %v2110_v4  ;;  %731 = vmatpush.bf16.msra.mxu1 %v2098_v12 }
 0x47a   :  { %894 = vmatpush.bf16.msra.mxu3 %v2566_v2 }
 0x47d   :  { %745 = vmatpush.bf16.msra.mxu2 %v2102_v14  ;;  %732 = vmatpush.bf16.msra.mxu1 %v2090_v19 }
 0x481   :  { %746 = vmatpush.bf16.msra.mxu2 %v2094_v21  ;;  %733 = vmatpush.bf16.msra.mxu1 %v2082_v26 }
 0x485   :  { %747 = vmatpush.bf16.msra.mxu2 %v2086_v29  ;;  %734 = vmatpush.bf16.msra.mxu1 %v2074_v37  ;;  %v3005_v37 = vld [vmem:[%s3131_s8] sm:$0xf] }
 0x486   :  { %v642_v38 = vperm.slane %v3005_v37, 0  ;;  %v643_v41 = vperm.slane %v3005_v37, 2 }
 0x489   :  { %748 = vmatpush.bf16.msra.mxu2 %v2078_v40  ;;  %735 = vmatpush.bf16.msra.mxu1 %v2066_v46  ;;  %v646_v40 = vperm.slane %v642_v38, 0  ;;  %v647_v46 = vperm.slane %v643_v41, 0  ;;  %v2241_v38 = vld [vmem:[#allocation2 + $0x240] sm:$0xf] }
 0x48d   :  { %749 = vmatpush.bf16.msra.mxu2 %v2070_v48 }
 0x4df   :  { %v591_v28 = vpop.xlane.xlu0 %590 }
 0x4e0   :  { %v2993_v30 = vmul.f32 0.0078125, %v591_v28 }
 0x4e1   :  { %v597_v31 = vpop.xlane.xlu2 %596 }
 0x4e2   :  { %v604_v35 = vmul.f32 %v2993_v30, %v2993_v30  ;;  %v602_v36 = vmul.f32 0.0078125, %v597_v31  ;;  %v608_v14 = vsub.f32 %v2982_v45, %v2993_v30  ;;  %v2565_v45 = vld [vmem:[#allocation5 + $0x18] sm:$0xff]  ;;  %v2574_v30 = vld [vmem:[#allocation5 + $0x60] sm:$0xff]  ;;  %v2564_v31 = vld [vmem:[#allocation5 + $0x10] sm:$0xff] }
 0x4e3   :  { %895 = vmatpush.bf16.msra.mxu3 %v2565_v45  ;;  %908 = vmatpush.bf16.msra.mxu0 %v2574_v30  ;;  %v2253_v45 = vld [vmem:[#allocation2 + $0x270] sm:$0xf]  ;;  %v2611_v30 = vld [vmem:[#allocation2 + $0x284] sm:$0xf0] }
 0x4e4   :  { %v606_v44 = vsub.f32 %v602_v36, %v604_v35  ;;  %v2571_v35 = vld [vmem:[#allocation5 + $0x48] sm:$0xff]  ;;  %v2570_v36 = vld [vmem:[#allocation5 + $0x40] sm:$0xff] }
 0x4e6   :  { %v610_v49 = vadd.f32 1e-06, %v606_v44 }
 0x4e7   :  { %v593_v50 = vpop.xlane.xlu1 %592  ;;  %896 = vmatpush.bf16.msra.mxu3 %v2564_v31  ;;  %909 = vmatpush.bf16.msra.mxu0 %v2573_v32  ;;  %v2608_v31 = vld [vmem:[#allocation2 + $0x274] sm:$0xf]  ;;  %v2254_v32 = vor.u32 %v2611_v30, %v2253_v45  ;;  %v2201_v45 = vld [vmem:[#allocation2 + $0x188] sm:$0xf] }
 0x4e8   :  { %2689 = vrsqrt.f32 %v610_v49  ;;  %v601_v52 = vmul.f32 0.0078125, %v593_v50  ;;  %vm618_vm11 = vweird.f32 %v610_v49 }
 0x4e9   :  { %v599_v59 = vpop.xlane.xlu0 %598 }
 0x4ea   :  { %v605_v53 = vmul.f32 %v601_v52, %v601_v52  ;;  %v603_v54 = vmul.f32 0.0078125, %v599_v59  ;;  %v609_v20 = vsub.f32 %v2988_v51, %v601_v52  ;;  %v2563_v51 = vld [vmem:[#allocation5 + $0x8] sm:$0xff] }
 0x4eb   :  { %897 = vmatpush.bf16.msra.mxu3 %v2563_v51  ;;  %910 = vmatpush.bf16.msra.mxu0 %v2572_v33  ;;  %v2255_v51 = vld [vmem:[#allocation2 + $0x288] sm:$0xf0]  ;;  %v2261_v33 = vld [vmem:[#allocation2 + $0x278] sm:$0xf] }
 0x4ec   :  { %v607_v57 = vsub.f32 %v603_v54, %v605_v53 }
 0x4ee   :  { %v2690_v61 = vpop.eup %2689  ;;  %v611_v62 = vadd.f32 1e-06, %v607_v57 }
 0x4ef   :  { %v613_v60 = vmul.f32 %v2690_v61, %v610_v49  ;;  %vm619_vm10 = vweird.f32 %v2690_v61  ;;  %898 = vmatpush.bf16.msra.mxu3 %v2562_v34  ;;  %911 = vmatpush.bf16.msra.mxu0 %v2571_v35  ;;  %v2612_v34 = vld [vmem:[#allocation2 + $0x28c] sm:$0xf0]  ;;  %v2258_v35 = vor.u32 %v2608_v31, %v2255_v51  ;;  %v2582_v31 = vld [vmem:[#allocation2 + $0x19c] sm:$0xf0] }
 0x4f0   :  { %2691 = vrsqrt.f32 %v611_v62  ;;  %vm620_vm12 = vmor %vm618_vm11, %vm619_vm10  ;;  %vm628_vm14 = vweird.f32 %v611_v62  ;;  %v2202_v51 = vor.u32 %v2582_v31, %v2201_v45 }
 0x4f1   :  { %v614_v0 = vmul.f32 %v2690_v61, %v613_v60 }
 0x4f3   :  { %v615_v1 = vmul.f32 0.5, %v614_v0  ;;  %912 = vmatpush.bf16.msra.mxu0 %v2570_v36  ;;  %v2262_v36 = vor.u32 %v2612_v34, %v2261_v33 }
 0x4f5   :  { %v616_v3 = vsub.f32 1.5, %v615_v1 }
 0x4f6   :  { %v2692_v4 = vpop.eup %2691 }
 0x4f7   :  { %v617_v5 = vmul.f32 %v2690_v61, %v616_v3  ;;  %v623_v6 = vmul.f32 %v2692_v4, %v611_v62  ;;  %vm629_vm13 = vweird.f32 %v2692_v4 }
 0x4f8   :  { %vm630_vm15 = vmor %vm628_vm14, %vm629_vm13 }
 0x4f9   :  { %v624_v11 = vmul.f32 %v2692_v4, %v623_v6  ;;  %v621_v12 = vsel %vm620_vm12, %v2690_v61, %v617_v5  ;;  %v2277_v6 = vld [vmem:[#allocation2 + $0x2d0] sm:$0xf] }
 0x4fa   :  { %v632_v16 = vmul.f32 %v621_v12, %v608_v14  ;;  %v2620_v12 = vld [vmem:[#allocation2 + $0x2d4] sm:$0xf]  ;;  %v2279_v14 = vld [vmem:[#allocation2 + $0x2e8] sm:$0xf0] }
 0x4fb   :  { %v625_v13 = vmul.f32 0.5, %v624_v11  ;;  %v2623_v11 = vld [vmem:[#allocation2 + $0x2e4] sm:$0xf0] }
 0x4fc   :  { %v635_v23 = vmul.f32 %v634_v18, %v632_v16  ;;  %v2624_v16 = vld [vmem:[#allocation2 + $0x2ec] sm:$0xf0] }
 0x4fd   :  { %v626_v15 = vsub.f32 1.5, %v625_v13  ;;  %v2278_v13 = vor.u32 %v2623_v11, %v2277_v6  ;;  %v2205_v11 = vld [vmem:[#allocation2 + $0x1b0] sm:$0xf] }
 0x4fe   :  { %v638_v27 = vadd.f32 %v637_v25, %v635_v23 }
 0x4ff   :  { %v627_v19 = vmul.f32 %v2692_v4, %v626_v15  ;;  %v2285_v15 = vld [vmem:[#allocation2 + $0x2d8] sm:$0xf]  ;;  %1149 = vmatpush.bf16.msrb.mxu1 %v2278_v13  ;;  %v2584_v13 = vld [vmem:[#allocation2 + $0x1b4] sm:$0xf] }
 0x501   :  { %v631_v21 = vsel %vm630_vm15, %v2692_v4, %v627_v19  ;;  %v2286_v19 = vor.u32 %v2624_v16, %v2285_v15 }
 0x502   :  { %v633_v22 = vmul.f32 %v631_v21, %v609_v20  ;;  %v2265_v20 = vld [vmem:[#allocation2 + $0x2a0] sm:$0xf]  ;;  %v2617_v21 = vld [vmem:[#allocation2 + $0x2b4] sm:$0xf0] }
 0x503   :  { %1177 = vmatpush.bf16.msrb.mxu3 %v2286_v19  ;;  %v2266_v23 = vor.u32 %v2617_v21, %v2265_v20  ;;  %v2213_v19 = vld [vmem:[#allocation2 + $0x1b8] sm:$0xf]  ;;  %v2588_v21 = vld [vmem:[#allocation2 + $0x1cc] sm:$0xf0] }
 0x504   :  { %v636_v26 = vmul.f32 %v634_v18, %v633_v22  ;;  %v2282_v18 = vor.u32 %v2620_v12, %v2279_v14  ;;  %v2614_v22 = vld [vmem:[#allocation2 + $0x2a4] sm:$0xf]  ;;  %v2587_v12 = vld [vmem:[#allocation2 + $0x1c4] sm:$0xf0] }
 0x505   :  { %1150 = vmatpush.bf16.msrb.mxu1 %v2266_v23  ;;  %v2206_v16 = vor.u32 %v2587_v12, %v2205_v11  ;;  %v2581_v23 = vld [vmem:[#allocation2 + $0x194] sm:$0xf0] }
 0x506   :  { %v639_v28 = vadd.f32 %v637_v25, %v636_v26  ;;  %1163 = vmatpush.bf16.msrb.mxu2 %v2282_v18  ;;  %v2267_v25 = vld [vmem:[#allocation2 + $0x2b8] sm:$0xf0]  ;;  %v2273_v26 = vld [vmem:[#allocation2 + $0x2a8] sm:$0xf]  ;;  %v2207_v18 = vld [vmem:[#allocation2 + $0x1c8] sm:$0xf0] }
 0x507   :  { %v2210_v20 = vor.u32 %v2584_v13, %v2207_v18 }
 0x508   :  { %v640_v29 = vpack.c.bf16 %v639_v28, %v638_v27 }
 0x509   :  { %1151 = vmatpush.bf16.msrb.mxu1 %v2254_v32 }
 0x50a   :  { %736 = vmatmul.bf16.vlgmr.msra.gmra.mxu1 %v640_v29  ;;  %750 = vmatmul.bf16.vlgmr.msra.gmra.mxu2 %v640_v29 }
 0x587   :  { %v737_v39 = vpop.f32.mrf.mxu1 }
 0x588   :  { %v738_v43 = vadd.f32 %v737_v39, %v646_v40  ;;  %v2605_v39 = vld [vmem:[#allocation2 + $0x254] sm:$0xf0] }
 0x589   :  { %v2242_v41 = vor.u32 %v2605_v39, %v2241_v38 }
 0x58a   :  { %v756_v49 = vmax.f32 %v738_v43, 0.0  ;;  %v2249_v43 = vld [vmem:[#allocation2 + $0x248] sm:$0xf] }
 0x58b   :  { %1152 = vmatpush.bf16.msrb.mxu1 %v2242_v41 }
 0x58d   :  { %v751_v42 = vpop.f32.mrf.mxu2 }
 0x58e   :  { %v752_v52 = vadd.f32 %v751_v42, %v647_v46  ;;  %v2243_v42 = vld [vmem:[#allocation2 + $0x258] sm:$0xf0] }
 0x58f   :  { %v739_v44 = vpop.f32.mrf.mxu1 }
 0x590   :  { %v740_v48 = vadd.f32 %v739_v44, %v646_v40  ;;  %v757_v55 = vmax.f32 %v752_v52, 0.0  ;;  %v2602_v40 = vld [vmem:[#allocation2 + $0x244] sm:$0xf]  ;;  %v2606_v44 = vld [vmem:[#allocation2 + $0x25c] sm:$0xf0] }
 0x591   :  { %v2596_v52 = vld [vmem:[#allocation2 + $0x214] sm:$0xf] }
 0x592   :  { %v758_v50 = vmax.f32 %v740_v48, 0.0  ;;  %v2250_v48 = vor.u32 %v2606_v44, %v2249_v43 }
 0x594   :  { %v760_v59 = vpack.c.bf16 %v758_v50, %v756_v49  ;;  %v2229_v49 = vld [vmem:[#allocation2 + $0x210] sm:$0xf]  ;;  %v2599_v50 = vld [vmem:[#allocation2 + $0x224] sm:$0xf0] }
 0x595   :  { %v753_v53 = vpop.f32.mrf.mxu2 }
 0x596   :  { %v754_v54 = vadd.f32 %v753_v53, %v647_v46  ;;  %899 = vmatmul.bf16.vlgmr.msra.gmra.mxu3 %v760_v59  ;;  %v2246_v46 = vor.u32 %v2602_v40, %v2243_v42  ;;  %v2230_v59 = vor.u32 %v2599_v50, %v2229_v49  ;;  %v2231_v53 = vld [vmem:[#allocation2 + $0x228] sm:$0xf0] }
 0x598   :  { %v759_v56 = vmax.f32 %v754_v54, 0.0  ;;  %v2237_v54 = vld [vmem:[#allocation2 + $0x218] sm:$0xf]  ;;  %1153 = vmatpush.bf16.msrb.mxu1 %v2230_v59 }
 0x59a   :  { %v761_v57 = vpack.c.bf16 %v759_v56, %v757_v55  ;;  %v2600_v55 = vld [vmem:[#allocation2 + $0x22c] sm:$0xf0]  ;;  %v2234_v56 = vor.u32 %v2596_v52, %v2231_v53 }
 0x59c   :  { %913 = vmatmul.bf16.vlgmr.msra.gmra.mxu0 %v761_v57  ;;  %v2238_v57 = vor.u32 %v2600_v55, %v2237_v54 }
 0x619   :  { %v900_v8 = vpop.f32.mrf.mxu3  ;;  %v914_v61 = vpop.f32.mrf.mxu0 }
 0x61a   :  { %v901_v62 = vadd.f32 %v900_v8, %v794_v58  ;;  %v2593_v8 = vld [vmem:[#allocation2 + $0x1f4] sm:$0xf0] }
 0x61c   :  { %v915_v60 = vadd.f32 %v914_v61, %v901_v62  ;;  %v2590_v61 = vld [vmem:[#allocation2 + $0x1e4] sm:$0xf] }
 0x61e   :  { %v3010_v10 = vadd.f32 %v915_v60, %v638_v27  ;;  %v2618_v27 = vld [vmem:[#allocation2 + $0x2bc] sm:$0xf0]  ;;  %v2219_v60 = vld [vmem:[#allocation2 + $0x1f8] sm:$0xf0] }
 0x61f   :  { %v2274_v29 = vor.u32 %v2618_v27, %v2273_v26  ;;  %v2214_v26 = vor.u32 %v2588_v21, %v2213_v19 }
 0x620   :  { %921 = vadd.xlane.f32.xlu1 %v3010_v10  ;;  %v925_v63 = vmul.f32 %v3010_v10, %v3010_v10 }
 0x621   :  { %v902_v0 = vpop.f32.mrf.mxu3  ;;  %v916_v2 = vpop.f32.mrf.mxu0  ;;  %1178 = vmatpush.bf16.msrb.mxu3 %v2274_v29  ;;  %v2195_v29 = vld [vmem:[#allocation2 + $0x198] sm:$0xf0] }
 0x622   :  { %v903_v1 = vadd.f32 %v902_v0, %v794_v58  ;;  %927 = vadd.xlane.f32.xlu0 %v925_v63  ;;  %v2217_v58 = vld [vmem:[#allocation2 + $0x1e0] sm:$0xf]  ;;  %v2225_v63 = vld [vmem:[#allocation2 + $0x1e8] sm:$0xf] }
 0x623   :  { %v2218_v62 = vor.u32 %v2593_v8, %v2217_v58  ;;  %v2594_v0 = vld [vmem:[#allocation2 + $0x1fc] sm:$0xf0] }
 0x624   :  { %v917_v3 = vadd.f32 %v916_v2, %v903_v1  ;;  %v2222_v2 = vor.u32 %v2590_v61, %v2219_v60 }
 0x625   :  { %1179 = vmatpush.bf16.msrb.mxu3 %v2262_v36  ;;  %1154 = vmatpush.bf16.msrb.mxu1 %v2218_v62 }
 0x626   :  { %v3015_v4 = vadd.f32 %v917_v3, %v639_v28  ;;  %v2270_v28 = vor.u32 %v2614_v22, %v2267_v25  ;;  %v2226_v3 = vor.u32 %v2594_v0, %v2225_v63  ;;  %v2193_v22 = vld [vmem:[#allocation2 + $0x180] sm:$0xf]  ;;  %v968_v63 = vperm.slane %v2933_v47, 5 }
 0x627   :  { %v2194_v27 = vor.u32 %v2581_v23, %v2193_v22 }
 0x628   :  { %923 = vadd.xlane.f32.xlu2 %v3015_v4  ;;  %v926_v5 = vmul.f32 %v3015_v4, %v3015_v4  ;;  %1164 = vmatpush.bf16.msrb.mxu2 %v2270_v28  ;;  %v2578_v28 = vld [vmem:[#allocation2 + $0x184] sm:$0xf] }
 0x629   :  { %1180 = vmatpush.bf16.msrb.mxu3 %v2250_v48  ;;  %1155 = vmatpush.bf16.msrb.mxu1 %v2206_v16  ;;  %v2198_v30 = vor.u32 %v2578_v28, %v2195_v29 }
 0x62a   :  { %929 = vadd.xlane.f32.xlu1 %v926_v5 }
 0x62c   :  { %1165 = vmatpush.bf16.msrb.mxu2 %v2258_v35 }
 0x62d   :  { %1181 = vmatpush.bf16.msrb.mxu3 %v2238_v57  ;;  %1156 = vmatpush.bf16.msrb.mxu1 %v2194_v27  ;;  %v965_v57 = vperm.slane %v2933_v47, 4 }
 0x630   :  { %1166 = vmatpush.bf16.msrb.mxu2 %v2246_v46 }
 0x631   :  { %1182 = vmatpush.bf16.msrb.mxu3 %v2226_v3 }
 0x634   :  { %1167 = vmatpush.bf16.msrb.mxu2 %v2234_v56 }
 0x635   :  { %1183 = vmatpush.bf16.msrb.mxu3 %v2214_v26 }
 0x638   :  { %1168 = vmatpush.bf16.msrb.mxu2 %v2222_v2 }
 0x639   :  { %1184 = vmatpush.bf16.msrb.mxu3 %v2202_v51 }
 0x63c   :  { %1169 = vmatpush.bf16.msrb.mxu2 %v2210_v20 }
 0x640   :  { %1170 = vmatpush.bf16.msrb.mxu2 %v2198_v30 }
 0x693   :  { %v922_v1 = vpop.xlane.xlu1 %921 }
 0x694   :  { %v931_v5 = vmul.f32 0.0078125, %v922_v1 }
 0x695   :  { %v928_v6 = vpop.xlane.xlu0 %927 }
 0x696   :  { %v935_v14 = vmul.f32 %v931_v5, %v931_v5  ;;  %v933_v15 = vmul.f32 0.0078125, %v928_v6  ;;  %v939_v54 = vsub.f32 %v3010_v10, %v931_v5 }
 0x698   :  { %v937_v25 = vsub.f32 %v933_v15, %v935_v14 }
 0x69a   :  { %v941_v32 = vadd.f32 1e-06, %v937_v25 }
 0x69b   :  { %v924_v33 = vpop.xlane.xlu2 %923 }
 0x69c   :  { %2693 = vrsqrt.f32 %v941_v32  ;;  %v932_v34 = vmul.f32 0.0078125, %v924_v33  ;;  %vm949_vm1 = vweird.f32 %v941_v32 }
 0x69d   :  { %v930_v35 = vpop.xlane.xlu1 %929 }
 0x69e   :  { %v936_v36 = vmul.f32 %v932_v34, %v932_v34  ;;  %v934_v38 = vmul.f32 0.0078125, %v930_v35  ;;  %v940_v8 = vsub.f32 %v3015_v4, %v932_v34 }
 0x6a0   :  { %v938_v39 = vsub.f32 %v934_v38, %v936_v36 }
 0x6a2   :  { %v2694_v40 = vpop.eup %2693  ;;  %v942_v41 = vadd.f32 1e-06, %v938_v39 }
 0x6a3   :  { %v944_v42 = vmul.f32 %v2694_v40, %v941_v32  ;;  %vm950_vm0 = vweird.f32 %v2694_v40 }
 0x6a4   :  { %2695 = vrsqrt.f32 %v942_v41  ;;  %vm951_vm2 = vmor %vm949_vm1, %vm950_vm0  ;;  %vm959_vm4 = vweird.f32 %v942_v41 }
 0x6a5   :  { %v945_v43 = vmul.f32 %v2694_v40, %v944_v42 }
 0x6a7   :  { %v946_v44 = vmul.f32 0.5, %v945_v43 }
 0x6a9   :  { %v947_v46 = vsub.f32 1.5, %v946_v44 }
 0x6aa   :  { %v2696_v48 = vpop.eup %2695 }
 0x6ab   :  { %v948_v49 = vmul.f32 %v2694_v40, %v947_v46  ;;  %v954_v50 = vmul.f32 %v2696_v48, %v942_v41  ;;  %vm960_vm3 = vweird.f32 %v2696_v48 }
 0x6ac   :  { %vm961_vm5 = vmor %vm959_vm4, %vm960_vm3 }
 0x6ad   :  { %v955_v52 = vmul.f32 %v2696_v48, %v954_v50  ;;  %v952_v59 = vsel %vm951_vm2, %v2694_v40, %v948_v49 }
 0x6ae   :  { %v963_v56 = vmul.f32 %v952_v59, %v939_v54  ;;  %v2317_v54 = vld [vmem:[#allocation2 + $0x2f0] sm:$0xf0] }
 0x6af   :  { %v956_v53 = vmul.f32 0.5, %v955_v52 }
 0x6b0   :  { %v966_v60 = vmul.f32 %v965_v57, %v963_v56 }
 0x6b1   :  { %v957_v55 = vsub.f32 1.5, %v956_v53  ;;  %v2621_v53 = vld [vmem:[#allocation2 + $0x2dc] sm:$0xf] }
 0x6b2   :  { %v3024_v1 = vadd.f32 %v968_v63, %v966_v60  ;;  %v2320_v56 = vor.u32 %v2621_v53, %v2317_v54  ;;  %v2603_v60 = vld [vmem:[#allocation2 + $0x24c] sm:$0xf]  ;;  %v2381_v53 = vld [vmem:[#allocation2 + $0x2f8] sm:$0xf0] }
 0x6b3   :  { %v958_v58 = vmul.f32 %v2696_v48, %v957_v55  ;;  %v2615_v55 = vld [vmem:[#allocation2 + $0x2ac] sm:$0xf] }
 0x6b5   :  { %v962_v61 = vsel %vm961_vm5, %v2696_v48, %v958_v58 }
 0x6b6   :  { %v964_v62 = vmul.f32 %v962_v61, %v940_v8  ;;  %v2609_v8 = vld [vmem:[#allocation2 + $0x27c] sm:$0xf]  ;;  %v2309_v61 = vld [vmem:[#allocation2 + $0x290] sm:$0xf0] }
 0x6b8   :  { %v967_v0 = vmul.f32 %v965_v57, %v964_v62  ;;  %v2313_v57 = vld [vmem:[#allocation2 + $0x2c0] sm:$0xf0]  ;;  %v2312_v62 = vor.u32 %v2609_v8, %v2309_v61  ;;  %v2363_v61 = vld [vmem:[#allocation2 + $0x280] sm:$0xf] }
 0x6b9   :  { %v2316_v58 = vor.u32 %v2615_v55, %v2313_v57  ;;  %v2371_v55 = vld [vmem:[#allocation2 + $0x2b0] sm:$0xf]  ;;  %v2616_v57 = vld [vmem:[#allocation2 + $0x2b4] sm:$0xf] }
 0x6ba   :  { %v3026_v2 = vadd.f32 %v968_v63, %v967_v0  ;;  %v2305_v63 = vld [vmem:[#allocation2 + $0x260] sm:$0xf0] }
 0x6bc   :  { %v1020_v10 = vpack.c.bf16 %v3026_v2, %v3024_v1 }
 0x6be   :  { %1157 = vmatmul.bf16.vlgmr.msrb.gmra.mxu1 %v1020_v10  ;;  %1171 = vmatmul.bf16.vlgmr.msrb.gmra.mxu2 %v1020_v10 }
 0x6bf   :  { %1185 = vmatmul.bf16.vlgmr.msrb.gmra.mxu3 %v1020_v10  ;;  %v2308_v10 = vor.u32 %v2603_v60, %v2305_v63  ;;  %v2610_v60 = vld [vmem:[#allocation2 + $0x284] sm:$0xf] }
 0x73b   :  { %v1158_v3 = vpop.f32.mrf.mxu1 }
 0x73c   :  { %v1193_v16 = vmul.f32 %v2945_v7, %v1158_v3  ;;  %v1253_v18 = vmul.f32 %v2947_v9, %v1158_v3  ;;  %v2597_v3 = vld [vmem:[#allocation2 + $0x21c] sm:$0xf] }
 0x741   :  { %v1172_v5 = vpop.f32.mrf.mxu2 }
 0x742   :  { %v1186_v4 = vpop.f32.mrf.mxu3 }
 0x743   :  { %v1160_v11 = vpop.f32.mrf.mxu1 }
 0x744   :  { %v1194_v47 = vmul.f32 %v2945_v7, %v1160_v11  ;;  %v1254_v15 = vmul.f32 %v2947_v9, %v1160_v11 }
 0x746   :  { %v1195_v19 = vpack.c.bf16 %v1194_v47, %v1193_v16  ;;  %v1255_v20 = vpack.c.bf16 %v1254_v15, %v1253_v18 }
 0x749   :  { %v1174_v6 = vpop.f32.mrf.mxu2 }
 0x74a   :  { %v1191_v12 = vpack.c.bf16 %v1174_v6, %v1172_v5  ;;  %v1188_v13 = vpop.f32.mrf.mxu3  ;;  %v2301_v5 = vld [vmem:[#allocation2 + $0x230] sm:$0xf0] }
 0x74b   :  { %v1192_v14 = vpack.c.bf16 %v1188_v13, %v1186_v4  ;;  %v2304_v6 = vor.u32 %v2597_v3, %v2301_v5  ;;  %v2355_v3 = vld [vmem:[#allocation2 + $0x250] sm:$0xf]  ;;  %v2607_v5 = vld [vmem:[#allocation2 + $0x264] sm:$0xf0] }
 0x74c   :  { %1203 = vmatpush.bf16.xpose.msrb.mxu0 %v1191_v12  ;;  %1263 = vmatpush.bf16.xpose.msra.mxu2 %v1191_v12 }
 0x74d   :  { %1243 = vmatpush.bf16.msra.mxu1 %v1192_v14 }
 0x751   :  { %1345 = vmatpush.bf16.msrb.mxu1 %v2320_v56 }
 0x753   :  { %1204 = vmatmul.bf16.vlgmr.msrb.gmra.mxu0 %v1195_v19  ;;  %1264 = vmatmul.bf16.vlgmr.msra.gmra.mxu2 %v1255_v20 }
 0x754   :  { %1303 = vmatpush.bf16.msra.mxu0 %v1192_v14  ;;  %1359 = vmatpush.bf16.msrb.mxu2 %v2320_v56  ;;  %v2619_v56 = vld [vmem:[#allocation2 + $0x2c4] sm:$0xf0] }
 0x755   :  { %1346 = vmatpush.bf16.msrb.mxu1 %v2316_v58 }
 0x758   :  { %1360 = vmatpush.bf16.msrb.mxu2 %v2316_v58  ;;  %v2372_v58 = vor.u32 %v2619_v56, %v2371_v55  ;;  %v2639_v56 = vld [vmem:[#allocation5 + $0xe8] sm:$0xff] }
 0x759   :  { %1347 = vmatpush.bf16.msrb.mxu1 %v2312_v62 }
 0x75c   :  { %1361 = vmatpush.bf16.msrb.mxu2 %v2312_v62  ;;  %v2613_v62 = vld [vmem:[#allocation2 + $0x294] sm:$0xf0] }
 0x75d   :  { %1348 = vmatpush.bf16.msrb.mxu1 %v2308_v10  ;;  %v2364_v63 = vor.u32 %v2613_v62, %v2363_v61 }
 0x760   :  { %1362 = vmatpush.bf16.msrb.mxu2 %v2308_v10 }
 0x761   :  { %1349 = vmatpush.bf16.msrb.mxu1 %v2304_v6 }
 0x764   :  { %1363 = vmatpush.bf16.msrb.mxu2 %v2304_v6  ;;  %v2356_v6 = vor.u32 %v2607_v5, %v2355_v3 }
 0x7d0   :  { %v1205_v21 = vpop.f32.mrf.mxu0 }
 0x7d1   :  { %v1206_v22 = vadd.f32 %v1205_v21, %v2956_v17 }
 0x7d3   :  { %v1210_v23 = vsel %vm424_vm9, %v1206_v22, -inf }
 0x7d4   :  { %1211 = vmax.xlane.f32.xlu2 %v1210_v23  ;;  %v2591_v23 = vld [vmem:[#allocation2 + $0x1ec] sm:$0xf] }
 0x7d6   :  { %v1265_v25 = vpop.f32.mrf.mxu2 }
 0x7d7   :  { %v1266_v26 = vadd.f32 %v1265_v25, %v2956_v17  ;;  %v2297_v25 = vld [vmem:[#allocation2 + $0x200] sm:$0xf0] }
 0x7d8   :  { %v1207_v27 = vpop.f32.mrf.mxu0 }
 0x7d9   :  { %v1208_v28 = vadd.f32 %v1207_v27, %v2965_v24  ;;  %v1270_v29 = vsel %vm424_vm9, %v1266_v26, -inf  ;;  %v2585_v27 = vld [vmem:[#allocation2 + $0x1bc] sm:$0xf] }
 0x7da   :  { %1271 = vmax.xlane.f32.xlu1 %v1270_v29 }
 0x7db   :  { %v1213_v45 = vsel %vm424_vm9, %v1208_v28, -inf }
 0x7dc   :  { %1214 = vmax.xlane.f32.xlu0 %v1213_v45  ;;  %v2579_v45 = vld [vmem:[#allocation2 + $0x18c] sm:$0xf] }
 0x7de   :  { %v1267_v30 = vpop.f32.mrf.mxu2 }
 0x7df   :  { %v1268_v31 = vadd.f32 %v1267_v30, %v2965_v24  ;;  %v2289_v30 = vld [vmem:[#allocation2 + $0x1a0] sm:$0xf0] }
 0x7e1   :  { %v1273_v32 = vsel %vm424_vm9, %v1268_v31, -inf }
 0x7e2   :  { %1274 = vmax.xlane.f32.xlu2 %v1273_v32 }
 0x847   :  { %v1212_v51 = vpop.xlane.xlu2 %1211 }
 0x848   :  { %v1216_v33 = vsub.f32 %v1206_v22, %v1212_v51 }
 0x84a   :  { %v1218_v34 = vmul.f32 1.442695, %v1216_v33 }
 0x84c   :  { %2697 = vpow2.f32 %v1218_v34 }
 0x84d   :  { %v1272_v17 = vpop.xlane.xlu1 %1271 }
 0x84e   :  { %v1276_v35 = vsub.f32 %v1266_v26, %v1272_v17  ;;  %v2300_v26 = vor.u32 %v2591_v23, %v2297_v25  ;;  %v2341_v23 = vld [vmem:[#allocation2 + $0x208] sm:$0xf0] }
 0x84f   :  { %v1215_v36 = vpop.xlane.xlu0 %1214 }
 0x850   :  { %v1278_v38 = vmul.f32 1.442695, %v1276_v35  ;;  %v1217_v39 = vsub.f32 %v1208_v28, %v1215_v36  ;;  %1364 = vmatpush.bf16.msrb.mxu2 %v2300_v26  ;;  %1350 = vmatpush.bf16.msrb.mxu1 %v2300_v26  ;;  %v2293_v28 = vld [vmem:[#allocation2 + $0x1d0] sm:$0xf0] }
 0x851   :  { %v2296_v29 = vor.u32 %v2585_v27, %v2293_v28 }
 0x852   :  { %v2698_v40 = vpop.eup %2697  ;;  %2699 = vpow2.f32 %v1278_v38  ;;  %v1220_v41 = vmul.f32 1.442695, %v1217_v39 }
 0x853   :  { %v1222_v42 = vsel %vm424_vm9, %v2698_v40, 0.0 }
 0x854   :  { %2701 = vpow2.f32 %v1220_v41  ;;  %1223 = vadd.xlane.f32.xlu0 %v1222_v42  ;;  %1365 = vmatpush.bf16.msrb.mxu2 %v2296_v29 }
 0x855   :  { %v1275_v24 = vpop.xlane.xlu2 %1274  ;;  %1351 = vmatpush.bf16.msrb.mxu1 %v2296_v29  ;;  %v2331_v29 = vld [vmem:[#allocation2 + $0x1c0] sm:$0xf] }
 0x856   :  { %v1277_v43 = vsub.f32 %v1268_v31, %v1275_v24  ;;  %v2292_v31 = vor.u32 %v2579_v45, %v2289_v30  ;;  %v2589_v45 = vld [vmem:[#allocation2 + $0x1d4] sm:$0xf0]  ;;  %v2586_v30 = vld [vmem:[#allocation2 + $0x1c4] sm:$0xf] }
 0x858   :  { %v2700_v44 = vpop.eup %2699  ;;  %v1280_v46 = vmul.f32 1.442695, %v1277_v43  ;;  %1366 = vmatpush.bf16.msrb.mxu2 %v2292_v31 }
 0x859   :  { %v1282_v48 = vsel %vm424_vm9, %v2700_v44, 0.0  ;;  %1352 = vmatpush.bf16.msrb.mxu1 %v2292_v31 }
 0x85a   :  { %v2702_v49 = vpop.eup %2701  ;;  %2703 = vpow2.f32 %v1280_v46  ;;  %1283 = vadd.xlane.f32.xlu2 %v1282_v48 }
 0x85b   :  { %v1225_v50 = vsel %vm424_vm9, %v2702_v49, 0.0 }
 0x85c   :  { %1226 = vadd.xlane.f32.xlu1 %v1225_v50  ;;  %v2625_v50 = vld [vmem:[#allocation2 + $0x2f4] sm:$0xf0] }
 0x860   :  { %v2704_v52 = vpop.eup %2703 }
 0x861   :  { %v1285_v59 = vsel %vm424_vm9, %v2704_v52, 0.0 }
 0x862   :  { %1286 = vadd.xlane.f32.xlu0 %v1285_v59 }
 0x8c7   :  { %v1224_v0 = vpop.xlane.xlu0 %1223 }
 0x8c8   :  { %2705 = vrcp.f32 %v1224_v0  ;;  %v2365_v0 = vld [vmem:[#allocation2 + $0x298] sm:$0xf0] }
 0x8c9   :  { %v2368_v10 = vor.u32 %v2610_v60, %v2365_v0 }
 0x8cd   :  { %v1284_v11 = vpop.xlane.xlu2 %1283 }
 0x8ce   :  { %v2706_v12 = vpop.eup %2705 }
 0x8cf   :  { %v1227_v4 = vpop.xlane.xlu1 %1226  ;;  %v1230_v47 = vmul.f32 %v2706_v12, %v2698_v40 }
 0x8d0   :  { %2707 = vrcp.f32 %v1227_v4  ;;  %v2604_v4 = vld [vmem:[#allocation2 + $0x254] sm:$0xf] }
 0x8d1   :  { %2709 = vrcp.f32 %v1284_v11  ;;  %v2357_v11 = vld [vmem:[#allocation2 + $0x268] sm:$0xf0] }
 0x8d2   :  { %v2360_v12 = vor.u32 %v2604_v4, %v2357_v11  ;;  %v2723_v11 = vld [vmem:[%s3130_s7] sm:$0xff] }
 0x8d5   :  { %v1287_v13 = vpop.xlane.xlu0 %1286 }
 0x8d6   :  { %v2708_v14 = vpop.eup %2707  ;;  %2711 = vrcp.f32 %v1287_v13  ;;  %v2347_v13 = vld [vmem:[#allocation2 + $0x220] sm:$0xf] }
 0x8d7   :  { %v1231_v15 = vmul.f32 %v2708_v14, %v2702_v49  ;;  %v2710_v18 = vpop.eup %2709  ;;  %v2601_v14 = vld [vmem:[#allocation2 + $0x234] sm:$0xf0] }
 0x8d8   :  { %v1290_v20 = vmul.f32 %v2710_v18, %v2700_v44 }
 0x8d9   :  { %v1232_v16 = vpack.c.bf16 %v1231_v15, %v1230_v47  ;;  %v2598_v47 = vld [vmem:[#allocation2 + $0x224] sm:$0xf]  ;;  %v2348_v15 = vor.u32 %v2601_v14, %v2347_v13  ;;  %v3076_v14 = vld [vmem:[%s3130_s7 + $0x8] sm:$0xf] }
 0x8db   :  { %2287 = vmatmul.msk.bf16.vlgmr.msra.gmra.mxu1 %vm424_vm9, %v1232_v16  ;;  %v2349_v16 = vld [vmem:[#allocation2 + $0x238] sm:$0xf0] }
 0x8dc   :  { %v2712_v19 = vpop.eup %2711  ;;  %v2352_v18 = vor.u32 %v2598_v47, %v2349_v16 }
 0x8dd   :  { %v1291_v21 = vmul.f32 %v2712_v19, %v2704_v52  ;;  %v2622_v52 = vld [vmem:[#allocation2 + $0x2e4] sm:$0xf]  ;;  %v2339_v19 = vld [vmem:[#allocation2 + $0x1f0] sm:$0xf] }
 0x8de   :  { %v2384_v54 = vor.u32 %v2622_v52, %v2381_v53  ;;  %v2640_v52 = vld [vmem:[#allocation5 + $0xf0] sm:$0xff] }
 0x8df   :  { %v1292_v22 = vpack.c.bf16 %v1291_v21, %v1290_v20  ;;  %v2595_v20 = vld [vmem:[#allocation2 + $0x204] sm:$0xf0]  ;;  %v2592_v21 = vld [vmem:[#allocation2 + $0x1f4] sm:$0xf] }
 0x8e0   :  { %1526 = vmatpush.bf16.msrb.mxu0 %v2384_v54  ;;  %v2344_v26 = vor.u32 %v2592_v21, %v2341_v23  ;;  %v2637_v23 = vld [vmem:[#allocation5 + $0xd8] sm:$0xff] }
 0x8e1   :  { %2288 = vmatmul.msk.bf16.vlgmr.msra.gmra.mxu0 %vm424_vm9, %v1292_v22  ;;  %v2340_v22 = vor.u32 %v2595_v20, %v2339_v19 }
 0x958   :  { %v1245_v32 = vpop.f32.mrf.mxu1 }
 0x959   :  { %v1250_v34 = vmul.f32 %v2945_v7, %v1245_v32 }
 0x95e   :  { %v1305_v51 = vpop.f32.mrf.mxu0 }
 0x95f   :  { %v1310_v38 = vmul.f32 %v2947_v9, %v1305_v51  ;;  %v2332_v51 = vor.u32 %v2589_v45, %v2331_v29  ;;  %v2634_v29 = vld [vmem:[#allocation5 + $0xc0] sm:$0xff]  ;;  %v2627_v45 = vld [vmem:[#allocation5 + $0x88] sm:$0xff] }
 0x960   :  { %v1247_v33 = vpop.f32.mrf.mxu1 }
 0x961   :  { %v1251_v17 = vmul.f32 %v2945_v7, %v1247_v33  ;;  %v2333_v33 = vld [vmem:[#allocation2 + $0x1d8] sm:$0xf0] }
 0x963   :  { %v1252_v35 = vpack.c.bf16 %v1251_v17, %v1250_v34  ;;  %v2323_v34 = vld [vmem:[#allocation2 + $0x190] sm:$0xf]  ;;  %v2336_v17 = vor.u32 %v2586_v30, %v2333_v33  ;;  %v2626_v30 = vld [vmem:[#allocation5 + $0x80] sm:$0xff]  ;;  %v1426_v33 = vperm.slane %v3005_v37, 1 }
 0x965   :  { %1367 = vmatmul.bf16.vlgmr.msrb.gmra.mxu2 %v1252_v35  ;;  %v2583_v35 = vld [vmem:[#allocation2 + $0x1a4] sm:$0xf0] }
 0x966   :  { %v1307_v36 = vpop.f32.mrf.mxu0 }
 0x967   :  { %v1311_v39 = vmul.f32 %v2947_v9, %v1307_v36  ;;  %v2580_v36 = vld [vmem:[#allocation2 + $0x194] sm:$0xf] }
 0x969   :  { %v1312_v40 = vpack.c.bf16 %v1311_v39, %v1310_v38  ;;  %v2325_v38 = vld [vmem:[#allocation2 + $0x1a8] sm:$0xf0] }
 0x96b   :  { %1353 = vmatmul.bf16.vlgmr.msrb.gmra.mxu1 %v1312_v40  ;;  %v2324_v40 = vor.u32 %v2583_v35, %v2323_v34 }
 0x9e8   :  { %v1354_v41 = vpop.f32.mrf.mxu1  ;;  %v1368_v42 = vpop.f32.mrf.mxu2 }
 0x9e9   :  { %v1369_v24 = vadd.f32 %v1368_v42, %v1354_v41  ;;  %v2328_v41 = vor.u32 %v2580_v36, %v2325_v38  ;;  %v1430_v36 = vperm.slane %v1426_v33, 1  ;;  %v2650_v33 = vld [vmem:[#allocation7 + $0x44] sm:$0xf] }
 0x9eb   :  { %v3053_v43 = vadd.f32 %v1369_v24, %v3024_v1  ;;  %v2379_v1 = vld [vmem:[#allocation2 + $0x2e0] sm:$0xf] }
 0x9ec   :  { %v2380_v59 = vor.u32 %v2625_v50, %v2379_v1  ;;  %v2633_v1 = vld [vmem:[#allocation5 + $0xb8] sm:$0xff] }
 0x9ed   :  { %1375 = vadd.xlane.f32.xlu1 %v3053_v43  ;;  %v1379_v7 = vmul.f32 %v3053_v43, %v3053_v43  ;;  %1676 = vmatpush.bf16.msra.mxu1 %v2633_v1 }
 0x9ee   :  { %1512 = vmatpush.bf16.msra.mxu3 %v2380_v59  ;;  %v2632_v59 = vld [vmem:[#allocation5 + $0xb0] sm:$0xff] }
 0x9ef   :  { %1381 = vadd.xlane.f32.xlu0 %v1379_v7 }
 0x9f0   :  { %v1356_v44 = vpop.f32.mrf.mxu1  ;;  %v1370_v46 = vpop.f32.mrf.mxu2 }
 0x9f1   :  { %v1371_v48 = vadd.f32 %v1370_v46, %v1356_v44  ;;  %1677 = vmatpush.bf16.msra.mxu1 %v2632_v59 }
 0x9f2   :  { %1513 = vmatpush.bf16.msra.mxu3 %v2372_v58 }
 0x9f3   :  { %v3059_v49 = vadd.f32 %v1371_v48, %v3026_v2  ;;  %v2373_v2 = vld [vmem:[#allocation2 + $0x2c8] sm:$0xf0] }
 0x9f4   :  { %v2376_v8 = vor.u32 %v2616_v57, %v2373_v2  ;;  %v2631_v57 = vld [vmem:[#allocation5 + $0xa8] sm:$0xff] }
 0x9f5   :  { %1377 = vadd.xlane.f32.xlu2 %v3059_v49  ;;  %v1380_v9 = vmul.f32 %v3059_v49, %v3059_v49  ;;  %1678 = vmatpush.bf16.msra.mxu1 %v2631_v57 }
 0x9f6   :  { %1527 = vmatpush.bf16.msrb.mxu0 %v2376_v8  ;;  %1514 = vmatpush.bf16.msra.mxu3 %v2364_v63  ;;  %v2638_v8 = vld [vmem:[#allocation5 + $0xe0] sm:$0xff] }
 0x9f7   :  { %1383 = vadd.xlane.f32.xlu1 %v1380_v9  ;;  %v2641_v9 = vld [vmem:[#allocation5 + $0xf8] sm:$0xff] }
 0x9f8   :  { %1690 = vmatpush.bf16.msra.mxu2 %v2641_v9  ;;  %v1579_v9 = vperm.slane %v3076_v14, 3 }
 0x9fa   :  { %1528 = vmatpush.bf16.msrb.mxu0 %v2368_v10  ;;  %1515 = vmatpush.bf16.msra.mxu3 %v2356_v6 }
 0x9fc   :  { %1691 = vmatpush.bf16.msra.mxu2 %v2640_v52 }
 0x9fe   :  { %1529 = vmatpush.bf16.msrb.mxu0 %v2360_v12  ;;  %1516 = vmatpush.bf16.msra.mxu3 %v2348_v15  ;;  %v1419_v12 = vperm.slane %v2723_v11, 7  ;;  %v2656_v11 = vld [vmem:[#allocation7 + $0x74] sm:$0xf] }
 0xa00   :  { %1692 = vmatpush.bf16.msra.mxu2 %v2639_v56 }
 0xa02   :  { %1530 = vmatpush.bf16.msrb.mxu0 %v2352_v18  ;;  %1517 = vmatpush.bf16.msra.mxu3 %v2340_v22  ;;  %v1422_v18 = vperm.slane %v3076_v14, 0 }
 0xa04   :  { %1693 = vmatpush.bf16.msra.mxu2 %v2638_v8 }
 0xa06   :  { %1531 = vmatpush.bf16.msrb.mxu0 %v2344_v26  ;;  %1518 = vmatpush.bf16.msra.mxu3 %v2332_v51  ;;  %v2636_v26 = vld [vmem:[#allocation5 + $0xd0] sm:$0xff] }
 0xa08   :  { %1694 = vmatpush.bf16.msra.mxu2 %v2637_v23  ;;  %v2655_v23 = vld [vmem:[#allocation7 + $0x64] sm:$0xf0] }
 0xa0a   :  { %1532 = vmatpush.bf16.msrb.mxu0 %v2336_v17  ;;  %1519 = vmatpush.bf16.msra.mxu3 %v2324_v40 }
 0xa0c   :  { %1695 = vmatpush.bf16.msra.mxu2 %v2636_v26 }
 0xa0e   :  { %1533 = vmatpush.bf16.msrb.mxu0 %v2328_v41 }
 0xa60   :  { %v1376_v25 = vpop.xlane.xlu1 %1375 }
 0xa61   :  { %v3064_v27 = vmul.f32 0.0078125, %v1376_v25  ;;  %v2630_v25 = vld [vmem:[#allocation5 + $0xa0] sm:$0xff] }
 0xa62   :  { %v1382_v28 = vpop.xlane.xlu0 %1381  ;;  %1679 = vmatpush.bf16.msra.mxu1 %v2630_v25 }
 0xa63   :  { %v1389_v31 = vmul.f32 %v3064_v27, %v3064_v27  ;;  %v1387_v32 = vmul.f32 0.0078125, %v1382_v28  ;;  %v1393_v5 = vsub.f32 %v3053_v43, %v3064_v27  ;;  %v2629_v27 = vld [vmem:[#allocation5 + $0x98] sm:$0xff]  ;;  %v2628_v28 = vld [vmem:[#allocation5 + $0x90] sm:$0xff] }
 0xa65   :  { %v1391_v39 = vsub.f32 %v1387_v32, %v1389_v31  ;;  %v1427_v31 = vperm.slane %v3005_v37, 3 }
 0xa66   :  { %1680 = vmatpush.bf16.msra.mxu1 %v2629_v27 }
 0xa67   :  { %v1395_v42 = vadd.f32 1e-06, %v1391_v39  ;;  %v1431_v51 = vperm.slane %v1427_v31, 1 }
 0xa68   :  { %v1378_v24 = vpop.xlane.xlu2 %1377 }
 0xa69   :  { %2713 = vrsqrt.f32 %v1395_v42  ;;  %v1386_v7 = vmul.f32 0.0078125, %v1378_v24  ;;  %vm1403_vm7 = vweird.f32 %v1395_v42 }
 0xa6a   :  { %v1384_v44 = vpop.xlane.xlu1 %1383  ;;  %1681 = vmatpush.bf16.msra.mxu1 %v2628_v28  ;;  %v2494_v28 = vld [vmem:[#allocation7 + $0x58] sm:$0xf0] }
 0xa6b   :  { %v1390_v46 = vmul.f32 %v1386_v7, %v1386_v7  ;;  %v1388_v48 = vmul.f32 0.0078125, %v1384_v44  ;;  %v1394_v47 = vsub.f32 %v3059_v49, %v1386_v7  ;;  %v2635_v49 = vld [vmem:[#allocation5 + $0xc8] sm:$0xff] }
 0xa6c   :  { %1696 = vmatpush.bf16.msra.mxu2 %v2635_v49  ;;  %v2652_v49 = vld [vmem:[#allocation7 + $0x54] sm:$0xf] }
 0xa6d   :  { %v1392_v50 = vsub.f32 %v1388_v48, %v1390_v46 }
 0xa6e   :  { %1682 = vmatpush.bf16.msra.mxu1 %v2627_v45  ;;  %v2653_v45 = vld [vmem:[#allocation7 + $0x54] sm:$0xf0] }
 0xa6f   :  { %v2714_v53 = vpop.eup %2713  ;;  %v1396_v54 = vadd.f32 1e-06, %v1392_v50 }
 0xa70   :  { %v1398_v55 = vmul.f32 %v2714_v53, %v1395_v42  ;;  %vm1404_vm6 = vweird.f32 %v2714_v53  ;;  %1697 = vmatpush.bf16.msra.mxu2 %v2634_v29  ;;  %v2492_v29 = vld [vmem:[#allocation7 + $0x50] sm:$0xf] }
 0xa71   :  { %2715 = vrsqrt.f32 %v1396_v54  ;;  %vm1405_vm8 = vmor %vm1403_vm7, %vm1404_vm6  ;;  %vm1413_vm11 = vweird.f32 %v1396_v54 }
 0xa72   :  { %v1399_v58 = vmul.f32 %v2714_v53, %v1398_v55  ;;  %1683 = vmatpush.bf16.msra.mxu1 %v2626_v30 }
 0xa74   :  { %v1400_v2 = vmul.f32 0.5, %v1399_v58 }
 0xa76   :  { %v1401_v61 = vsub.f32 1.5, %v1400_v2 }
 0xa77   :  { %v2716_v62 = vpop.eup %2715 }
 0xa78   :  { %v1402_v60 = vmul.f32 %v2714_v53, %v1401_v61  ;;  %v1408_v63 = vmul.f32 %v2716_v62, %v1396_v54  ;;  %vm1414_vm10 = vweird.f32 %v2716_v62  ;;  %v3096_v61 = vld [vmem:[%s3125_s2] sm:$0xf]  ;;  %s2836_s2 = smov [#allocation8]  }
 0xa79   :  { %vm1415_vm12 = vmor %vm1413_vm11, %vm1414_vm10  ;;  %1758 = vst [vmem:[#allocation1] ss:$4 sm:$0xff] %v3096_v61  ;;  %s1916_s29 = sshll.u32 %s2836_s2, 4  ;;  %s1917_s29 = int_to_ptr.vmem [resolvable:$true] %s1916_s29 }
 0xa7a   :  { %v1409_v0 = vmul.f32 %v2716_v62, %v1408_v63  ;;  %v1406_v10 = vsel %vm1405_vm8, %v2714_v53, %v1402_v60 }
 0xa7b   :  { %v1417_v6 = vmul.f32 %v1406_v10, %v1393_v5 }
 0xa7c   :  { %v1410_v3 = vmul.f32 0.5, %v1409_v0 }
 0xa7d   :  { %v1420_v16 = vmul.f32 %v1419_v12, %v1417_v6 }
 0xa7e   :  { %v1411_v4 = vsub.f32 1.5, %v1410_v3 }
 0xa7f   :  { %v1423_v20 = vadd.f32 %v1422_v18, %v1420_v16  ;;  %v2657_v16 = vld [vmem:[#allocation7 + $0x74] sm:$0xf0] }
 0xa80   :  { %v1412_v13 = vmul.f32 %v2716_v62, %v1411_v4 }
 0xa82   :  { %v1416_v15 = vsel %vm1415_vm12, %v2716_v62, %v1412_v13 }
 0xa83   :  { %v1418_v43 = vmul.f32 %v1416_v15, %v1394_v47  ;;  %v2510_v47 = vld [vmem:[#allocation7 + $0x78] sm:$0xf0]  ;;  %v2508_v15 = vld [vmem:[#allocation7 + $0x70] sm:$0xf] }
 0xa85   :  { %v1421_v19 = vmul.f32 %v1419_v12, %v1418_v43  ;;  %v2513_v43 = vor.u32 %v2656_v11, %v2510_v47  ;;  %v2460_v11 = vld [vmem:[#allocation7 + $0x10] sm:$0xf] }
 0xa87   :  { %v1424_v21 = vadd.f32 %v1422_v18, %v1421_v19  ;;  %v2654_v18 = vld [vmem:[#allocation7 + $0x64] sm:$0xf]  ;;  %v2502_v19 = vld [vmem:[#allocation7 + $0x68] sm:$0xf0]  ;;  %1892 = vmatpush.bf16.msrb.mxu3 %v2513_v43 }
 0xa88   :  { %v2505_v25 = vor.u32 %v2654_v18, %v2502_v19 }
 0xa89   :  { %v1425_v22 = vpack.c.bf16 %v1424_v21, %v1423_v20 }
 0xa8b   :  { %1520 = vmatmul.bf16.vlgmr.msra.gmra.mxu3 %v1425_v22  ;;  %1534 = vmatmul.bf16.vlgmr.msrb.gmra.mxu0 %v1425_v22  ;;  %v2500_v22 = vld [vmem:[#allocation7 + $0x60] sm:$0xf] }
 0xa8c   :  { %v2501_v27 = vor.u32 %v2655_v23, %v2500_v22  ;;  %1893 = vmatpush.bf16.msrb.mxu3 %v2505_v25  ;;  %v2454_v22 = vld [vmem:[#allocation7 + $0x8] sm:$0xf0]  ;;  %v2643_v23 = vld [vmem:[#allocation7 + $0x4] sm:$0xf0] }
 0xb08   :  { %v1535_v32 = vpop.f32.mrf.mxu0 }
 0xb09   :  { %v1536_v17 = vadd.f32 %v1535_v32, %v1431_v51  ;;  %v2497_v32 = vor.u32 %v2652_v49, %v2494_v28 }
 0xb0b   :  { %v1541_v39 = vmax.f32 %v1536_v17, 0.0  ;;  %1894 = vmatpush.bf16.msrb.mxu3 %v2497_v32 }
 0xb0e   :  { %v1521_v34 = vpop.f32.mrf.mxu3 }
 0xb0f   :  { %v1522_v41 = vadd.f32 %v1521_v34, %v1430_v36  ;;  %v2486_v34 = vld [vmem:[#allocation7 + $0x48] sm:$0xf0] }
 0xb10   :  { %v1537_v35 = vpop.f32.mrf.mxu0 }
 0xb11   :  { %v1538_v38 = vadd.f32 %v1537_v35, %v1431_v51  ;;  %v1540_v44 = vmax.f32 %v1522_v41, 0.0  ;;  %v2493_v51 = vor.u32 %v2653_v45, %v2492_v29  ;;  %v2484_v35 = vld [vmem:[#allocation7 + $0x40] sm:$0xf] }
 0xb13   :  { %v1543_v40 = vmax.f32 %v1538_v38, 0.0 }
 0xb15   :  { %v1545_v42 = vpack.c.bf16 %v1543_v40, %v1541_v39  ;;  %v2489_v39 = vor.u32 %v2650_v33, %v2486_v34 }
 0xb16   :  { %v1523_v24 = vpop.f32.mrf.mxu3 }
 0xb17   :  { %v1524_v7 = vadd.f32 %v1523_v24, %v1430_v36  ;;  %1698 = vmatmul.bf16.vlgmr.msra.gmra.mxu2 %v1545_v42  ;;  %v2651_v36 = vld [vmem:[#allocation7 + $0x44] sm:$0xf0]  ;;  %v2648_v42 = vld [vmem:[#allocation7 + $0x34] sm:$0xf]  ;;  %v2478_v24 = vld [vmem:[#allocation7 + $0x38] sm:$0xf0]  ;;  %1895 = vmatpush.bf16.msrb.mxu3 %v2489_v39 }
 0xb18   :  { %v2485_v41 = vor.u32 %v2651_v36, %v2484_v35 }
 0xb19   :  { %v1542_v46 = vmax.f32 %v1524_v7, 0.0 }
 0xb1b   :  { %v1544_v48 = vpack.c.bf16 %v1542_v46, %v1540_v44  ;;  %v2476_v46 = vld [vmem:[#allocation7 + $0x30] sm:$0xf] }
 0xb1d   :  { %1684 = vmatmul.bf16.vlgmr.msra.gmra.mxu1 %v1544_v48  ;;  %v2649_v48 = vld [vmem:[#allocation7 + $0x34] sm:$0xf0] }
 0xb9a   :  { %v1685_v1 = vpop.f32.mrf.mxu1  ;;  %v1699_v37 = vpop.f32.mrf.mxu2 }
 0xb9b   :  { %v1686_v50 = vadd.f32 %v1685_v1, %v1579_v9 }
 0xb9d   :  { %v1700_v52 = vadd.f32 %v1699_v37, %v1686_v50  ;;  %v2481_v37 = vor.u32 %v2648_v42, %v2478_v24 }
 0xb9f   :  { %v3083_v59 = vadd.f32 %v1700_v52, %v1423_v20  ;;  %v1750_v52 = vperm.slane %v3076_v14, 1  ;;  %1896 = vmatpush.bf16.msrb.mxu3 %v2481_v37 }
 0xba1   :  { %1706 = vadd.xlane.f32.xlu0 %v3083_v59  ;;  %v1710_v2 = vmul.f32 %v3083_v59, %v3083_v59 }
 0xba2   :  { %v1687_v53 = vpop.f32.mrf.mxu1  ;;  %v1701_v55 = vpop.f32.mrf.mxu2 }
 0xba3   :  { %v1688_v54 = vadd.f32 %v1687_v53, %v1579_v9  ;;  %v2477_v53 = vor.u32 %v2649_v48, %v2476_v46 }
 0xba5   :  { %v1702_v56 = vadd.f32 %v1701_v55, %v1688_v54  ;;  %v2646_v54 = vld [vmem:[#allocation7 + $0x24] sm:$0xf]  ;;  %v2470_v55 = vld [vmem:[#allocation7 + $0x28] sm:$0xf0] }
 0xba7   :  { %v3086_v57 = vadd.f32 %v1702_v56, %v1424_v21  ;;  %v2509_v21 = vor.u32 %v2657_v16, %v2508_v15 }
 0xba9   :  { %1708 = vadd.xlane.f32.xlu2 %v3086_v57  ;;  %v1711_v58 = vmul.f32 %v3086_v57, %v3086_v57  ;;  %1879 = vmatpush.bf16.msra.mxu0 %v2509_v21  ;;  %v2642_v21 = vld [vmem:[#allocation7 + $0x4] sm:$0xf] }
 0xbab   :  { %1714 = vadd.xlane.f32.xlu1 %v1711_v58 }
 0xbad   :  { %1880 = vmatpush.bf16.msra.mxu0 %v2501_v27 }
 0xbb1   :  { %1712 = vadd.xlane.f32.xlu2 %v1710_v2  ;;  %1881 = vmatpush.bf16.msra.mxu0 %v2493_v51  ;;  %v2468_v2 = vld [vmem:[#allocation7 + $0x20] sm:$0xf] }
 0xbb5   :  { %1882 = vmatpush.bf16.msra.mxu0 %v2485_v41 }
 0xbb9   :  { %1883 = vmatpush.bf16.msra.mxu0 %v2477_v53 }
 0xc14   :  { %v1707_v60 = vpop.xlane.xlu0 %1706 }
 0xc15   :  { %v3103_v3 = vmul.f32 0.0078125, %v1707_v60 }
 0xc17   :  { %v1720_v12 = vmul.f32 %v3103_v3, %v3103_v3 }
 0xc1c   :  { %v1709_v8 = vpop.xlane.xlu2 %1708 }
 0xc1d   :  { %v3098_v62 = vmul.f32 0.0078125, %v1709_v8  ;;  %v2647_v8 = vld [vmem:[#allocation7 + $0x24] sm:$0xf0] }
 0xc1e   :  { %v1715_v63 = vpop.xlane.xlu1 %1714 }
 0xc1f   :  { %v1721_v0 = vmul.f32 %v3098_v62, %v3098_v62  ;;  %v1719_v10 = vmul.f32 0.0078125, %v1715_v63  ;;  %v1725_v50 = vsub.f32 %v3086_v57, %v3098_v62  ;;  %v1753_v63 = vperm.slane %v3076_v14, 2  ;;  %v2644_v62 = vld [vmem:[#allocation7 + $0x14] sm:$0xf] }
 0xc20   :  { %v2469_v57 = vor.u32 %v2647_v8, %v2468_v2 }
 0xc21   :  { %v1723_v5 = vsub.f32 %v1719_v10, %v1721_v0  ;;  %v2473_v10 = vor.u32 %v2646_v54, %v2470_v55 }
 0xc22   :  { %1884 = vmatpush.bf16.msra.mxu0 %v2469_v57 }
 0xc23   :  { %v1727_v4 = vadd.f32 1e-06, %v1723_v5  ;;  %1897 = vmatpush.bf16.msrb.mxu3 %v2473_v10 }
 0xc24   :  { %v1713_v6 = vpop.xlane.xlu2 %1712 }
 0xc25   :  { %2717 = vrsqrt.f32 %v1727_v4  ;;  %v1718_v13 = vmul.f32 0.0078125, %v1713_v6  ;;  %vm1744_vm14 = vweird.f32 %v1727_v4 }
 0xc27   :  { %v1722_v20 = vsub.f32 %v1718_v13, %v1720_v12  ;;  %v2645_v12 = vld [vmem:[#allocation7 + $0x14] sm:$0xf0]  ;;  %v1724_v13 = vsub.f32 %v3083_v59, %v3103_v3  ;;  %v2452_v59 = vld [vmem:[#allocation7] sm:$0xf]  ;;  %v2457_v3 = vor.u32 %v2642_v21, %v2454_v22 }
 0xc28   :  { %v2461_v16 = vor.u32 %v2645_v12, %v2460_v11  ;;  %v2453_v25 = vor.u32 %v2643_v23, %v2452_v59 }
 0xc29   :  { %v3107_v26 = vadd.f32 1e-06, %v1722_v20  ;;  %v1759_v20 = vld.sshfl [vmem:[#allocation1 + $0x8] sm:$0xff pattern:$0x73625140] }
 0xc2a   :  { %1885 = vmatpush.bf16.msra.mxu0 %v2461_v16 }
 0xc2b   :  { %v2718_v30 = vpop.eup %2717  ;;  %2719 = vrsqrt.f32 %v3107_v26  ;;  %vm1734_vm1 = vweird.f32 %v3107_v26 }
 0xc2c   :  { %v1739_v31 = vmul.f32 %v2718_v30, %v1727_v4  ;;  %vm1745_vm13 = vweird.f32 %v2718_v30  ;;  %v2462_v4 = vld [vmem:[#allocation7 + $0x18] sm:$0xf0] }
 0xc2d   :  { %vm1746_vm15 = vmor %vm1744_vm14, %vm1745_vm13  ;;  %v2465_v15 = vor.u32 %v2644_v62, %v2462_v4 }
 0xc2e   :  { %v1740_v17 = vmul.f32 %v2718_v30, %v1739_v31  ;;  %1886 = vmatpush.bf16.msra.mxu0 %v2453_v25 }
 0xc2f   :  { %1898 = vmatpush.bf16.msrb.mxu3 %v2465_v15 }
 0xc30   :  { %v1741_v38 = vmul.f32 0.5, %v1740_v17 }
 0xc31   :  { %v2720_v40 = vpop.eup %2719 }
 0xc32   :  { %v1742_v7 = vsub.f32 1.5, %v1741_v38  ;;  %v1729_v44 = vmul.f32 %v2720_v40, %v3107_v26  ;;  %vm1735_vm0 = vweird.f32 %v2720_v40 }
 0xc33   :  { %vm1736_vm2 = vmor %vm1734_vm1, %vm1735_vm0  ;;  %1899 = vmatpush.bf16.msrb.mxu3 %v2457_v3 }
 0xc34   :  { %v1743_v9 = vmul.f32 %v2718_v30, %v1742_v7  ;;  %v1730_v1 = vmul.f32 %v2720_v40, %v1729_v44 }
 0xc36   :  { %v1747_v56 = vsel %vm1746_vm15, %v2718_v30, %v1743_v9  ;;  %v1731_v58 = vmul.f32 0.5, %v1730_v1 }
 0xc37   :  { %v1749_v60 = vmul.f32 %v1747_v56, %v1725_v50 }
 0xc38   :  { %v1732_v0 = vsub.f32 1.5, %v1731_v58 }
 0xc39   :  { %v1752_v5 = vmul.f32 %v1750_v52, %v1749_v60 }
 0xc3a   :  { %v1733_v6 = vmul.f32 %v2720_v40, %v1732_v0 }
 0xc3b   :  { %v1755_v47 = vadd.f32 %v1753_v63, %v1752_v5 }
 0xc3c   :  { %v1737_v14 = vsel %vm1736_vm2, %v2720_v40, %v1733_v6 }
 0xc3d   :  { %1776 = vmatpush.msrb.mxu1 %v1755_v47  ;;  %v1748_v43 = vmul.f32 %v1737_v14, %v1724_v13 }
 0xc3f   :  { %v1751_v18 = vmul.f32 %v1750_v52, %v1748_v43 }
 0xc41   :  { %v1754_v19 = vadd.f32 %v1753_v63, %v1751_v18 }
 0xc43   :  { %1777 = vmatpush.msrb.mxu1 %v1754_v19 }
 0xc44   :  { %2449 = vmatmul.msk.f32.vlgmr.msrb.gmra.mxu1 %vm424_vm9, %v1759_v20 }
 0xcc1   :  { %v1779_v26 = vpop.f32.mrf.mxu1 }
 0xcc2   :  { %v1782_v27 = vpack.c.bf16 %v1779_v26, %v1779_v26 }
 0xcc4   :  { %1900 = vmatmul.bf16.vlgmr.msrb.gmra.mxu3 %v1782_v27  ;;  %1887 = vmatmul.bf16.vlgmr.msra.gmra.mxu0 %v1782_v27 }
 0xd41   :  { %v1888_v49 = vpop.f32.mrf.mxu0 }
 0xd47   :  { %v1901_v28 = vpop.f32.mrf.mxu3 }
 0xd48   :  { %v1905_v29 = vmul.f32 0.5, %v1901_v28 }
 0xd49   :  { %v1890_v45 = vpop.f32.mrf.mxu0 }
 0xd4a   :  { %v1906_v30 = vmul.f32 1.442695, %v1905_v29 }
 0xd4c   :  { %2721 = vpow2.f32 %v1906_v30 }
 0xd4f   :  { %v1903_v31 = vpop.f32.mrf.mxu3 }
 0xd52   :  { %v2722_v32 = vpop.eup %2721 }
 0xd53   :  { %v1908_v51 = vmul.f32 %v2722_v32, %v3096_v61 }
 0xd55   :  { %v1909_v33 = vadd.f32 %v1908_v51, %v1888_v49 }
 0xd57   :  { %1910 = vst [vmem:[#allocation8] sm:$0x3] %v1909_v33 }
 0xd58   :  { %1921 = dma.vmem_to_hbm [thread:$0]  %s1917_s29, 32, %s1919_s6, [#allocation4]  }
 0xd59   :  { %2824 = dma.done.wait [#allocation4], 32  }
 0xd5a   :  { %2825 = vsyncadd [#allocation4], 4294967264 }
 0xd5b   :  { %1926 = vsyncpa [#allocation3], 1 }
 0xd5c   :  { %1927 = vsyncpa [#allocation6], 1 }
 0xd5d   :  { %1928 = vsyncpa [#allocation4], 1 }

</bundles_post_ra>
